<compile_context>
chip_gen: v5e
topology: v5e:2x2
jax: 0.10.0
libtpu: 0.0.40
codegen_flags: <defaults>
</compile_context>

<pallas_src>
import functools

import jax
import jax.numpy as jnp
from jax import lax
from jax.experimental import pallas as pl
from jax.experimental.pallas import tpu as pltpu


def _make_seq2seq_gru_kernel(Ta, Tc, B, H):
    """Fused bidirectional-GRU kernel: anchor encoder then candidate encoder.

    Inputs (whole-array VMEM refs):
      gia_ref [Ta, B, 6H] f32  anchor input projections (x@W_ih + b_ih),
                               lanes = [r_f|r_b|z_f|z_b|n_f|n_b]; the *_b lanes
                               are already time-reversed (index i holds t=Ta-1-i).
      gic_ref [Tc, B, 6H] f32  candidate input projections, same layout.
      wa_ref  [2H, 6H]   bf16  anchor hidden weights, block-diagonal over
                               direction (rows 0:H -> fwd gates, H:2H -> bwd).
      ba_ref  [1, 6H]    f32   anchor hidden biases (same lane layout).
      wc_ref  [2H, 6H]   bf16  candidate hidden weights.
      bc_ref  [1, 6H]    f32   candidate hidden biases.
      lena_ref [B, 1]    i32   anchor valid lengths.
      lenc_ref [B, 1]    i32   candidate valid lengths.
    Output:
      out_ref [B, 4H] f32: [anchor_pool_f | anchor_pool_b | cand_pool_f | cand_pool_b]
    """
    H2 = 2 * H
    H4 = 4 * H

    def kernel(gia_ref, gic_ref, wa_ref, ba_ref, wc_ref, bc_ref,
               lena_ref, lenc_ref, out_ref):
        len_a = lena_ref[...]                       # [B, 1] i32
        len_c = lenc_ref[...]
        # Exact divide (runs once in the epilogue); clamp so empty sequences
        # give zeros instead of NaN (documented divergence from torch mean).
        inv_a = 1.0 / jnp.maximum(len_a, 1).astype(jnp.float32)
        inv_c = 1.0 / jnp.maximum(len_c, 1).astype(jnp.float32)

        # Lane map: first H lanes of the packed state are the fwd direction,
        # next H lanes the bwd direction (loop-invariant, hoisted).
        lane_is_fwd = lax.broadcasted_iota(jnp.int32, (B, H2), 1) < H

        def run_encoder(gi_ref, T, w_bd, b_cat, lengths, h0):
            # h0 / h: [B, 2H] f32 = [h_fwd | h_bwd]; acc: running masked sum.
            def step(i, carry):
                h, acc = carry
                # One lane-dense input-projection load per step (bwd lanes are
                # pre-reversed, so index i serves both directions).
                gi = gi_ref[i]                                       # [B, 6H] f32
                # Single bf16 MXU push per step: fused gates + fused directions.
                gh = jnp.dot(h.astype(jnp.bfloat16), w_bd,
                             preferred_element_type=jnp.float32) + b_cat
                # r,z occupy lanes [0:4H) (one full vreg row @ H=32).
                rz = jax.nn.sigmoid(gi[:, :H4] + gh[:, :H4])         # [B, 4H]
                r = rz[:, :H2]
                z = rz[:, H2:]
                n = jnp.tanh(gi[:, H4:] + r * gh[:, H4:])            # [B, 2H]
                h_new = (1.0 - z) * n + z * h
                # Per-lane time index: fwd lanes -> t=i, bwd lanes -> t=T-1-i.
                t_lane = jnp.where(lane_is_fwd, i, T - 1 - i)        # [B, 2H] i32
                mask = (t_lane < lengths).astype(jnp.float32)        # [B, 2H]
                h_next = h + mask * (h_new - h)       # packed-seq carry (select)
                acc = acc + mask * h_new              # sum of valid steps
                return h_next, acc

            acc0 = jnp.zeros((B, H2), jnp.float32)
            # Capped unroll: steady-state perf with bounded vreg live ranges.
            return lax.fori_loop(0, T, step, (h0, acc0), unroll=min(T, 8))

        w_a = wa_ref[...]
        b_a = ba_ref[...]
        w_c = wc_ref[...]
        b_c = bc_ref[...]

        zeros = jnp.zeros((B, H2), jnp.float32)
        # Anchor encoder: zero initial hidden state.
        hA, accA = run_encoder(gia_ref, Ta, w_a, b_a, len_a, zeros)
        # Candidate encoder: initialized with the anchor's final hidden state
        # (fwd half from anchor fwd, bwd half from anchor bwd — already packed).
        _, accC = run_encoder(gic_ref, Tc, w_c, b_c, len_c, hA)

        # Single lane-dense [B, 4H] store (128 lanes at H=32).
        out_ref[...] = jnp.concatenate([accA * inv_a, accC * inv_c], axis=-1)

    return kernel


def _pack_gru_params(rnn):
    """Pack PyTorch-layout bidirectional GRU params into kernel layout.

    Returns:
      wi [E, 6H] f32   input weights, columns = [r_f|r_b|z_f|z_b|n_f|n_b]
      bi [6H]    f32   input biases, same layout
      wh [2H,6H] bf16  hidden weights, block-diagonal over direction
      bh [1, 6H] f32   hidden biases, same lane layout
    """
    H = rnn["w_hh_f"].shape[1]

    def gates_w(w):   # [3H, X] -> (r, z, n), each [X, H] (pre-transposed)
        return [w[g * H:(g + 1) * H, :].T for g in range(3)]

    def gates_b(b):   # [3H] -> (r, z, n), each [H]
        return [b[g * H:(g + 1) * H] for g in range(3)]

    rf_i, zf_i, nf_i = gates_w(rnn["w_ih_f"])
    rb_i, zb_i, nb_i = gates_w(rnn["w_ih_b"])
    wi = jnp.concatenate([rf_i, rb_i, zf_i, zb_i, nf_i, nb_i], axis=1)   # [E, 6H]

    rf_bi, zf_bi, nf_bi = gates_b(rnn["b_ih_f"])
    rb_bi, zb_bi, nb_bi = gates_b(rnn["b_ih_b"])
    bi = jnp.concatenate([rf_bi, rb_bi, zf_bi, zb_bi, nf_bi, nb_bi])     # [6H]

    rf_h, zf_h, nf_h = gates_w(rnn["w_hh_f"])
    rb_h, zb_h, nb_h = gates_w(rnn["w_hh_b"])
    zero = jnp.zeros((H, H), jnp.float32)
    top = jnp.concatenate([rf_h, zero, zf_h, zero, nf_h, zero], axis=1)  # [H, 6H]
    bot = jnp.concatenate([zero, rb_h, zero, zb_h, zero, nb_h], axis=1)  # [H, 6H]
    wh = jnp.concatenate([top, bot], axis=0).astype(jnp.bfloat16)        # [2H, 6H]

    rf_bh, zf_bh, nf_bh = gates_b(rnn["b_hh_f"])
    rb_bh, zb_bh, nb_bh = gates_b(rnn["b_hh_b"])
    bh = jnp.concatenate(
        [rf_bh, rb_bh, zf_bh, zb_bh, nf_bh, nb_bh]).reshape(1, 6 * H)    # [1, 6H]

    return wi, bi, wh, bh


def _input_projections(x_tbe, wi, bi, H):
    """Hoisted input GEMM for all timesteps / gates / directions.

    Returns [T, B, 6H] with lanes [r_f|r_b|z_f|z_b|n_f|n_b]; the *_b lanes are
    time-reversed so the kernel reads one lane-dense row per step.
    """
    T, B, _ = x_tbe.shape
    gi = jnp.einsum('tbe,eg->tbg', x_tbe, wi) + bi          # [T, B, 6H]
    g = gi.reshape(T, B, 3, 2, H)                           # (gate, dir, H)
    g_fwd = g[:, :, :, 0, :]
    g_bwd = g[:, :, :, 1, :][::-1]                          # reverse in time
    return jnp.stack([g_fwd, g_bwd], axis=3).reshape(T, B, 6 * H)


def seq2seq_encoder_forward(params, anchor_ids, anchor_len, cand_ids, cand_len):
    """Mirrors Seq2SeqEncoder.forward: returns (anchorEmb [B,2H], candidateEmb [B,2H])."""
    emb = params["embedding"]                               # [V, E]
    B, Ta = anchor_ids.shape
    _, Tc = cand_ids.shape

    wia, bia, wha, bha = _pack_gru_params(params["anchor_rnn"])
    wic, bic, whc, bhc = _pack_gru_params(params["candidate_rnn"])
    H = bha.shape[-1] // 6

    # Embedding lookup (glue), time-major [T, B, E].
    xa = jnp.transpose(emb[anchor_ids], (1, 0, 2)).astype(jnp.float32)
    xc = jnp.transpose(emb[cand_ids], (1, 0, 2)).astype(jnp.float32)

    # Hoisted batched input GEMMs (off the serial recurrence chain).
    gia = _input_projections(xa, wia, bia, H)               # [Ta, B, 6H]
    gic = _input_projections(xc, wic, bic, H)               # [Tc, B, 6H]

    lena = jnp.reshape(anchor_len, (B, 1)).astype(jnp.int32)
    lenc = jnp.reshape(cand_len, (B, 1)).astype(jnp.int32)

    kernel = _make_seq2seq_gru_kernel(Ta, Tc, B, H)
    vmem = pl.BlockSpec(memory_space=pltpu.MemorySpace.VMEM)
    out = pl.pallas_call(
        kernel,
        out_shape=jax.ShapeDtypeStruct((B, 4 * H), jnp.float32),
        in_specs=[vmem] * 8,
        out_specs=vmem,
        compiler_params=pltpu.CompilerParams(vmem_limit_bytes=32 * 1024 * 1024),
    )(gia, gic, wha, bha, whc, bhc, lena, lenc)

    anchorEmb = out[:, :2 * H]       # 'mean' fixed-size pooling of anchor outputs
    candidateEmb = out[:, 2 * H:]    # 'mean' pooling of candidate outputs
    # dropout=0.0 -> identity (Dropout is None in the reference module)
    return anchorEmb, candidateEmb


def init_gru_params(key, embed_dim, hidden):
    ks = jax.random.split(key, 8)
    s = 0.1

    def u(k, shape):
        return jax.random.uniform(k, shape, jnp.float32, -s, s)

    return {
        "w_ih_f": u(ks[0], (3 * hidden, embed_dim)),
        "w_hh_f": u(ks[1], (3 * hidden, hidden)),
        "b_ih_f": u(ks[2], (3 * hidden,)),
        "b_hh_f": u(ks[3], (3 * hidden,)),
        "w_ih_b": u(ks[4], (3 * hidden, embed_dim)),
        "w_hh_b": u(ks[5], (3 * hidden, hidden)),
        "b_ih_b": u(ks[6], (3 * hidden,)),
        "b_hh_b": u(ks[7], (3 * hidden,)),
    }


if __name__ == "__main__":
    B, T, V, E, H = 2, 8, 50, 32, 32

    root = jax.random.PRNGKey(0)
    k_emb, k_a, k_c, k_ids_a, k_ids_c = jax.random.split(root, 5)

    params = {
        "embedding": jax.random.normal(k_emb, (V, E), jnp.float32) * 0.1,
        "anchor_rnn": init_gru_params(k_a, E, H),
        "candidate_rnn": init_gru_params(k_c, E, H),
    }

    anchor_ids = jax.random.randint(k_ids_a, (B, T), 0, V, jnp.int32)
    cand_ids = jax.random.randint(k_ids_c, (B, T), 0, V, jnp.int32)
    anchor_len = jnp.array([T, 5], jnp.int32)
    cand_len = jnp.array([6, T], jnp.int32)

    fwd = jax.jit(functools.partial(seq2seq_encoder_forward, params))
    anchorEmb, candidateEmb = fwd(anchor_ids, anchor_len, cand_ids, cand_len)
    jax.block_until_ready((anchorEmb, candidateEmb))

    assert anchorEmb.shape == (B, 2 * H) and candidateEmb.shape == (B, 2 * H)
    assert bool(jnp.all(jnp.isfinite(anchorEmb))) and bool(jnp.all(jnp.isfinite(candidateEmb)))
    print("KERNEL_OK")
</pallas_src>

<mosaic_0001>
module attributes {stable_mosaic.version = 11 : i64} {
  func.func @kernel(%arg0: memref<8x2x192xf32, #tpu.memory_space<vmem>>, %arg1: memref<8x2x192xf32, #tpu.memory_space<vmem>>, %arg2: memref<64x192xbf16, #tpu.memory_space<vmem>>, %arg3: memref<1x192xf32, #tpu.memory_space<vmem>>, %arg4: memref<64x192xbf16, #tpu.memory_space<vmem>>, %arg5: memref<1x192xf32, #tpu.memory_space<vmem>>, %arg6: memref<2x1xi32, #tpu.memory_space<vmem>>, %arg7: memref<2x1xi32, #tpu.memory_space<vmem>>, %arg8: memref<2x128xf32, #tpu.memory_space<vmem>>) attributes {dimension_semantics = [], scalar_prefetch = 0 : i64, scratch_operands = 0 : i64, tpu.core_type = #tpu.core_type<tc>} {
    %c0 = arith.constant 0 : index
    %c0_0 = arith.constant 0 : index
    %0 = vector.load %arg6[%c0, %c0_0] : memref<2x1xi32, #tpu.memory_space<vmem>>, vector<2x1xi32>
    %c0_1 = arith.constant 0 : index
    %c0_2 = arith.constant 0 : index
    %1 = vector.load %arg7[%c0_1, %c0_2] : memref<2x1xi32, #tpu.memory_space<vmem>>, vector<2x1xi32>
    %c1_i32 = arith.constant 1 : i32
    %2 = vector.broadcast %c1_i32 : i32 to vector<2x1xi32>
    %3 = arith.maxsi %0, %2 : vector<2x1xi32>
    %4 = arith.sitofp %3 : vector<2x1xi32> to vector<2x1xf32>
    %cst = arith.constant 1.000000e+00 : f32
    %5 = vector.broadcast %cst : f32 to vector<2x1xf32>
    %6 = arith.divf %5, %4 : vector<2x1xf32>
    %c1_i32_3 = arith.constant 1 : i32
    %7 = vector.broadcast %c1_i32_3 : i32 to vector<2x1xi32>
    %8 = arith.maxsi %1, %7 : vector<2x1xi32>
    %9 = arith.sitofp %8 : vector<2x1xi32> to vector<2x1xf32>
    %cst_4 = arith.constant 1.000000e+00 : f32
    %10 = vector.broadcast %cst_4 : f32 to vector<2x1xf32>
    %11 = arith.divf %10, %9 : vector<2x1xf32>
    %12 = tpu.iota {dimensions = array<i32: 1>} : vector<2x64xi32>
    %c32_i32 = arith.constant 32 : i32
    %13 = vector.broadcast %c32_i32 : i32 to vector<2x64xi32>
    %14 = arith.cmpi slt, %12, %13 : vector<2x64xi32>
    %c0_5 = arith.constant 0 : index
    %c0_6 = arith.constant 0 : index
    %15 = vector.load %arg2[%c0_5, %c0_6] : memref<64x192xbf16, #tpu.memory_space<vmem>>, vector<64x192xbf16>
    %c0_7 = arith.constant 0 : index
    %c0_8 = arith.constant 0 : index
    %16 = vector.load %arg3[%c0_7, %c0_8] : memref<1x192xf32, #tpu.memory_space<vmem>>, vector<1x192xf32>
    %c0_9 = arith.constant 0 : index
    %c0_10 = arith.constant 0 : index
    %17 = vector.load %arg4[%c0_9, %c0_10] : memref<64x192xbf16, #tpu.memory_space<vmem>>, vector<64x192xbf16>
    %c0_11 = arith.constant 0 : index
    %c0_12 = arith.constant 0 : index
    %18 = vector.load %arg5[%c0_11, %c0_12] : memref<1x192xf32, #tpu.memory_space<vmem>>, vector<1x192xf32>
    %cst_13 = arith.constant 0.000000e+00 : f32
    %19 = vector.broadcast %cst_13 : f32 to vector<2x64xf32>
    %cst_14 = arith.constant 0.000000e+00 : f32
    %20 = vector.broadcast %cst_14 : f32 to vector<2x64xf32>
    %c0_i32 = arith.constant 0 : i32
    %21 = arith.index_cast %c0_i32 : i32 to index
    %c0_15 = arith.constant 0 : index
    %c0_16 = arith.constant 0 : index
    %22 = vector.load %arg0[%21, %c0_15, %c0_16] : memref<8x2x192xf32, #tpu.memory_space<vmem>>, vector<1x2x192xf32>
    %23 = vector.shape_cast %22 : vector<1x2x192xf32> to vector<2x192xf32>
    %24 = arith.truncf %19 : vector<2x64xf32> to vector<2x64xbf16>
    %cst_17 = arith.constant dense<0.000000e+00> : vector<2x192xf32>
    %25 = tpu.matmul %24, %15, %cst_17 {dimension_numbers = #tpu.dot_dimension_numbers<[1], [0], [0], [1], [0, 0, 1, 1], [], []>} : vector<2x64xbf16>, vector<64x192xbf16>, vector<2x192xf32> -> vector<2x192xf32>
    %26 = vector.broadcast %16 : vector<1x192xf32> to vector<2x192xf32>
    %27 = arith.addf %25, %26 : vector<2x192xf32>
    %28 = vector.extract_strided_slice %23 {offsets = [0, 0], sizes = [2, 128], strides = [1, 1]} : vector<2x192xf32> to vector<2x128xf32>
    %29 = vector.extract_strided_slice %27 {offsets = [0, 0], sizes = [2, 128], strides = [1, 1]} : vector<2x192xf32> to vector<2x128xf32>
    %30 = arith.addf %28, %29 : vector<2x128xf32>
    %31 = arith.negf %30 : vector<2x128xf32>
    %32 = math.exp %31 : vector<2x128xf32>
    %cst_18 = arith.constant 1.000000e+00 : f32
    %33 = vector.broadcast %cst_18 : f32 to vector<2x128xf32>
    %34 = arith.addf %33, %32 : vector<2x128xf32>
    %35 = arith.divf %33, %34 : vector<2x128xf32>
    %36 = vector.extract_strided_slice %35 {offsets = [0, 0], sizes = [2, 64], strides = [1, 1]} : vector<2x128xf32> to vector<2x64xf32>
    %37 = vector.extract_strided_slice %35 {offsets = [0, 64], sizes = [2, 64], strides = [1, 1]} : vector<2x128xf32> to vector<2x64xf32>
    %38 = vector.extract_strided_slice %23 {offsets = [0, 128], sizes = [2, 64], strides = [1, 1]} : vector<2x192xf32> to vector<2x64xf32>
    %39 = vector.extract_strided_slice %27 {offsets = [0, 128], sizes = [2, 64], strides = [1, 1]} : vector<2x192xf32> to vector<2x64xf32>
    %40 = arith.mulf %36, %39 : vector<2x64xf32>
    %41 = arith.addf %38, %40 : vector<2x64xf32>
    %42 = math.tanh %41 : vector<2x64xf32>
    %cst_19 = arith.constant 1.000000e+00 : f32
    %43 = vector.broadcast %cst_19 : f32 to vector<2x64xf32>
    %44 = arith.subf %43, %37 : vector<2x64xf32>
    %45 = arith.mulf %44, %42 : vector<2x64xf32>
    %46 = arith.mulf %37, %19 : vector<2x64xf32>
    %47 = arith.addf %45, %46 : vector<2x64xf32>
    %c7_i32 = arith.constant 7 : i32
    %48 = arith.subi %c7_i32, %c0_i32 : i32
    %49 = vector.broadcast %c0_i32 : i32 to vector<2x64xi32>
    %50 = vector.broadcast %48 : i32 to vector<2x64xi32>
    %51 = arith.select %14, %49, %50 : vector<2x64xi1>, vector<2x64xi32>
    %52 = vector.broadcast %0 : vector<2x1xi32> to vector<2x64xi32>
    %53 = arith.cmpi slt, %51, %52 : vector<2x64xi32>
    %54 = arith.extui %53 : vector<2x64xi1> to vector<2x64xi32>
    %55 = arith.sitofp %54 : vector<2x64xi32> to vector<2x64xf32>
    %56 = arith.subf %47, %19 : vector<2x64xf32>
    %57 = arith.mulf %55, %56 : vector<2x64xf32>
    %58 = arith.addf %19, %57 : vector<2x64xf32>
    %59 = arith.mulf %55, %47 : vector<2x64xf32>
    %60 = arith.addf %20, %59 : vector<2x64xf32>
    %c1_i32_20 = arith.constant 1 : i32
    %61 = arith.index_cast %c1_i32_20 : i32 to index
    %c0_21 = arith.constant 0 : index
    %c0_22 = arith.constant 0 : index
    %62 = vector.load %arg0[%61, %c0_21, %c0_22] : memref<8x2x192xf32, #tpu.memory_space<vmem>>, vector<1x2x192xf32>
    %63 = vector.shape_cast %62 : vector<1x2x192xf32> to vector<2x192xf32>
    %64 = arith.truncf %58 : vector<2x64xf32> to vector<2x64xbf16>
    %cst_23 = arith.constant dense<0.000000e+00> : vector<2x192xf32>
    %65 = tpu.matmul %64, %15, %cst_23 {dimension_numbers = #tpu.dot_dimension_numbers<[1], [0], [0], [1], [0, 0, 1, 1], [], []>} : vector<2x64xbf16>, vector<64x192xbf16>, vector<2x192xf32> -> vector<2x192xf32>
    %66 = vector.broadcast %16 : vector<1x192xf32> to vector<2x192xf32>
    %67 = arith.addf %65, %66 : vector<2x192xf32>
    %68 = vector.extract_strided_slice %63 {offsets = [0, 0], sizes = [2, 128], strides = [1, 1]} : vector<2x192xf32> to vector<2x128xf32>
    %69 = vector.extract_strided_slice %67 {offsets = [0, 0], sizes = [2, 128], strides = [1, 1]} : vector<2x192xf32> to vector<2x128xf32>
    %70 = arith.addf %68, %69 : vector<2x128xf32>
    %71 = arith.negf %70 : vector<2x128xf32>
    %72 = math.exp %71 : vector<2x128xf32>
    %cst_24 = arith.constant 1.000000e+00 : f32
    %73 = vector.broadcast %cst_24 : f32 to vector<2x128xf32>
    %74 = arith.addf %73, %72 : vector<2x128xf32>
    %75 = arith.divf %73, %74 : vector<2x128xf32>
    %76 = vector.extract_strided_slice %75 {offsets = [0, 0], sizes = [2, 64], strides = [1, 1]} : vector<2x128xf32> to vector<2x64xf32>
    %77 = vector.extract_strided_slice %75 {offsets = [0, 64], sizes = [2, 64], strides = [1, 1]} : vector<2x128xf32> to vector<2x64xf32>
    %78 = vector.extract_strided_slice %63 {offsets = [0, 128], sizes = [2, 64], strides = [1, 1]} : vector<2x192xf32> to vector<2x64xf32>
    %79 = vector.extract_strided_slice %67 {offsets = [0, 128], sizes = [2, 64], strides = [1, 1]} : vector<2x192xf32> to vector<2x64xf32>
    %80 = arith.mulf %76, %79 : vector<2x64xf32>
    %81 = arith.addf %78, %80 : vector<2x64xf32>
    %82 = math.tanh %81 : vector<2x64xf32>
    %cst_25 = arith.constant 1.000000e+00 : f32
    %83 = vector.broadcast %cst_25 : f32 to vector<2x64xf32>
    %84 = arith.subf %83, %77 : vector<2x64xf32>
    %85 = arith.mulf %84, %82 : vector<2x64xf32>
    %86 = arith.mulf %77, %58 : vector<2x64xf32>
    %87 = arith.addf %85, %86 : vector<2x64xf32>
    %c7_i32_26 = arith.constant 7 : i32
    %88 = arith.subi %c7_i32_26, %c1_i32_20 : i32
    %89 = vector.broadcast %c1_i32_20 : i32 to vector<2x64xi32>
    %90 = vector.broadcast %88 : i32 to vector<2x64xi32>
    %91 = arith.select %14, %89, %90 : vector<2x64xi1>, vector<2x64xi32>
    %92 = vector.broadcast %0 : vector<2x1xi32> to vector<2x64xi32>
    %93 = arith.cmpi slt, %91, %92 : vector<2x64xi32>
    %94 = arith.extui %93 : vector<2x64xi1> to vector<2x64xi32>
    %95 = arith.sitofp %94 : vector<2x64xi32> to vector<2x64xf32>
    %96 = arith.subf %87, %58 : vector<2x64xf32>
    %97 = arith.mulf %95, %96 : vector<2x64xf32>
    %98 = arith.addf %58, %97 : vector<2x64xf32>
    %99 = arith.mulf %95, %87 : vector<2x64xf32>
    %100 = arith.addf %60, %99 : vector<2x64xf32>
    %c2_i32 = arith.constant 2 : i32
    %101 = arith.index_cast %c2_i32 : i32 to index
    %c0_27 = arith.constant 0 : index
    %c0_28 = arith.constant 0 : index
    %102 = vector.load %arg0[%101, %c0_27, %c0_28] : memref<8x2x192xf32, #tpu.memory_space<vmem>>, vector<1x2x192xf32>
    %103 = vector.shape_cast %102 : vector<1x2x192xf32> to vector<2x192xf32>
    %104 = arith.truncf %98 : vector<2x64xf32> to vector<2x64xbf16>
    %cst_29 = arith.constant dense<0.000000e+00> : vector<2x192xf32>
    %105 = tpu.matmul %104, %15, %cst_29 {dimension_numbers = #tpu.dot_dimension_numbers<[1], [0], [0], [1], [0, 0, 1, 1], [], []>} : vector<2x64xbf16>, vector<64x192xbf16>, vector<2x192xf32> -> vector<2x192xf32>
    %106 = vector.broadcast %16 : vector<1x192xf32> to vector<2x192xf32>
    %107 = arith.addf %105, %106 : vector<2x192xf32>
    %108 = vector.extract_strided_slice %103 {offsets = [0, 0], sizes = [2, 128], strides = [1, 1]} : vector<2x192xf32> to vector<2x128xf32>
    %109 = vector.extract_strided_slice %107 {offsets = [0, 0], sizes = [2, 128], strides = [1, 1]} : vector<2x192xf32> to vector<2x128xf32>
    %110 = arith.addf %108, %109 : vector<2x128xf32>
    %111 = arith.negf %110 : vector<2x128xf32>
    %112 = math.exp %111 : vector<2x128xf32>
    %cst_30 = arith.constant 1.000000e+00 : f32
    %113 = vector.broadcast %cst_30 : f32 to vector<2x128xf32>
    %114 = arith.addf %113, %112 : vector<2x128xf32>
    %115 = arith.divf %113, %114 : vector<2x128xf32>
    %116 = vector.extract_strided_slice %115 {offsets = [0, 0], sizes = [2, 64], strides = [1, 1]} : vector<2x128xf32> to vector<2x64xf32>
    %117 = vector.extract_strided_slice %115 {offsets = [0, 64], sizes = [2, 64], strides = [1, 1]} : vector<2x128xf32> to vector<2x64xf32>
    %118 = vector.extract_strided_slice %103 {offsets = [0, 128], sizes = [2, 64], strides = [1, 1]} : vector<2x192xf32> to vector<2x64xf32>
    %119 = vector.extract_strided_slice %107 {offsets = [0, 128], sizes = [2, 64], strides = [1, 1]} : vector<2x192xf32> to vector<2x64xf32>
    %120 = arith.mulf %116, %119 : vector<2x64xf32>
    %121 = arith.addf %118, %120 : vector<2x64xf32>
    %122 = math.tanh %121 : vector<2x64xf32>
    %cst_31 = arith.constant 1.000000e+00 : f32
    %123 = vector.broadcast %cst_31 : f32 to vector<2x64xf32>
    %124 = arith.subf %123, %117 : vector<2x64xf32>
    %125 = arith.mulf %124, %122 : vector<2x64xf32>
    %126 = arith.mulf %117, %98 : vector<2x64xf32>
    %127 = arith.addf %125, %126 : vector<2x64xf32>
    %c7_i32_32 = arith.constant 7 : i32
    %128 = arith.subi %c7_i32_32, %c2_i32 : i32
    %129 = vector.broadcast %c2_i32 : i32 to vector<2x64xi32>
    %130 = vector.broadcast %128 : i32 to vector<2x64xi32>
    %131 = arith.select %14, %129, %130 : vector<2x64xi1>, vector<2x64xi32>
    %132 = vector.broadcast %0 : vector<2x1xi32> to vector<2x64xi32>
    %133 = arith.cmpi slt, %131, %132 : vector<2x64xi32>
    %134 = arith.extui %133 : vector<2x64xi1> to vector<2x64xi32>
    %135 = arith.sitofp %134 : vector<2x64xi32> to vector<2x64xf32>
    %136 = arith.subf %127, %98 : vector<2x64xf32>
    %137 = arith.mulf %135, %136 : vector<2x64xf32>
    %138 = arith.addf %98, %137 : vector<2x64xf32>
    %139 = arith.mulf %135, %127 : vector<2x64xf32>
    %140 = arith.addf %100, %139 : vector<2x64xf32>
    %c3_i32 = arith.constant 3 : i32
    %141 = arith.index_cast %c3_i32 : i32 to index
    %c0_33 = arith.constant 0 : index
    %c0_34 = arith.constant 0 : index
    %142 = vector.load %arg0[%141, %c0_33, %c0_34] : memref<8x2x192xf32, #tpu.memory_space<vmem>>, vector<1x2x192xf32>
    %143 = vector.shape_cast %142 : vector<1x2x192xf32> to vector<2x192xf32>
    %144 = arith.truncf %138 : vector<2x64xf32> to vector<2x64xbf16>
    %cst_35 = arith.constant dense<0.000000e+00> : vector<2x192xf32>
    %145 = tpu.matmul %144, %15, %cst_35 {dimension_numbers = #tpu.dot_dimension_numbers<[1], [0], [0], [1], [0, 0, 1, 1], [], []>} : vector<2x64xbf16>, vector<64x192xbf16>, vector<2x192xf32> -> vector<2x192xf32>
    %146 = vector.broadcast %16 : vector<1x192xf32> to vector<2x192xf32>
    %147 = arith.addf %145, %146 : vector<2x192xf32>
    %148 = vector.extract_strided_slice %143 {offsets = [0, 0], sizes = [2, 128], strides = [1, 1]} : vector<2x192xf32> to vector<2x128xf32>
    %149 = vector.extract_strided_slice %147 {offsets = [0, 0], sizes = [2, 128], strides = [1, 1]} : vector<2x192xf32> to vector<2x128xf32>
    %150 = arith.addf %148, %149 : vector<2x128xf32>
    %151 = arith.negf %150 : vector<2x128xf32>
    %152 = math.exp %151 : vector<2x128xf32>
    %cst_36 = arith.constant 1.000000e+00 : f32
    %153 = vector.broadcast %cst_36 : f32 to vector<2x128xf32>
    %154 = arith.addf %153, %152 : vector<2x128xf32>
    %155 = arith.divf %153, %154 : vector<2x128xf32>
    %156 = vector.extract_strided_slice %155 {offsets = [0, 0], sizes = [2, 64], strides = [1, 1]} : vector<2x128xf32> to vector<2x64xf32>
    %157 = vector.extract_strided_slice %155 {offsets = [0, 64], sizes = [2, 64], strides = [1, 1]} : vector<2x128xf32> to vector<2x64xf32>
    %158 = vector.extract_strided_slice %143 {offsets = [0, 128], sizes = [2, 64], strides = [1, 1]} : vector<2x192xf32> to vector<2x64xf32>
    %159 = vector.extract_strided_slice %147 {offsets = [0, 128], sizes = [2, 64], strides = [1, 1]} : vector<2x192xf32> to vector<2x64xf32>
    %160 = arith.mulf %156, %159 : vector<2x64xf32>
    %161 = arith.addf %158, %160 : vector<2x64xf32>
    %162 = math.tanh %161 : vector<2x64xf32>
    %cst_37 = arith.constant 1.000000e+00 : f32
    %163 = vector.broadcast %cst_37 : f32 to vector<2x64xf32>
    %164 = arith.subf %163, %157 : vector<2x64xf32>
    %165 = arith.mulf %164, %162 : vector<2x64xf32>
    %166 = arith.mulf %157, %138 : vector<2x64xf32>
    %167 = arith.addf %165, %166 : vector<2x64xf32>
    %c7_i32_38 = arith.constant 7 : i32
    %168 = arith.subi %c7_i32_38, %c3_i32 : i32
    %169 = vector.broadcast %c3_i32 : i32 to vector<2x64xi32>
    %170 = vector.broadcast %168 : i32 to vector<2x64xi32>
    %171 = arith.select %14, %169, %170 : vector<2x64xi1>, vector<2x64xi32>
    %172 = vector.broadcast %0 : vector<2x1xi32> to vector<2x64xi32>
    %173 = arith.cmpi slt, %171, %172 : vector<2x64xi32>
    %174 = arith.extui %173 : vector<2x64xi1> to vector<2x64xi32>
    %175 = arith.sitofp %174 : vector<2x64xi32> to vector<2x64xf32>
    %176 = arith.subf %167, %138 : vector<2x64xf32>
    %177 = arith.mulf %175, %176 : vector<2x64xf32>
    %178 = arith.addf %138, %177 : vector<2x64xf32>
    %179 = arith.mulf %175, %167 : vector<2x64xf32>
    %180 = arith.addf %140, %179 : vector<2x64xf32>
    %c4_i32 = arith.constant 4 : i32
    %181 = arith.index_cast %c4_i32 : i32 to index
    %c0_39 = arith.constant 0 : index
    %c0_40 = arith.constant 0 : index
    %182 = vector.load %arg0[%181, %c0_39, %c0_40] : memref<8x2x192xf32, #tpu.memory_space<vmem>>, vector<1x2x192xf32>
    %183 = vector.shape_cast %182 : vector<1x2x192xf32> to vector<2x192xf32>
    %184 = arith.truncf %178 : vector<2x64xf32> to vector<2x64xbf16>
    %cst_41 = arith.constant dense<0.000000e+00> : vector<2x192xf32>
    %185 = tpu.matmul %184, %15, %cst_41 {dimension_numbers = #tpu.dot_dimension_numbers<[1], [0], [0], [1], [0, 0, 1, 1], [], []>} : vector<2x64xbf16>, vector<64x192xbf16>, vector<2x192xf32> -> vector<2x192xf32>
    %186 = vector.broadcast %16 : vector<1x192xf32> to vector<2x192xf32>
    %187 = arith.addf %185, %186 : vector<2x192xf32>
    %188 = vector.extract_strided_slice %183 {offsets = [0, 0], sizes = [2, 128], strides = [1, 1]} : vector<2x192xf32> to vector<2x128xf32>
    %189 = vector.extract_strided_slice %187 {offsets = [0, 0], sizes = [2, 128], strides = [1, 1]} : vector<2x192xf32> to vector<2x128xf32>
    %190 = arith.addf %188, %189 : vector<2x128xf32>
    %191 = arith.negf %190 : vector<2x128xf32>
    %192 = math.exp %191 : vector<2x128xf32>
    %cst_42 = arith.constant 1.000000e+00 : f32
    %193 = vector.broadcast %cst_42 : f32 to vector<2x128xf32>
    %194 = arith.addf %193, %192 : vector<2x128xf32>
    %195 = arith.divf %193, %194 : vector<2x128xf32>
    %196 = vector.extract_strided_slice %195 {offsets = [0, 0], sizes = [2, 64], strides = [1, 1]} : vector<2x128xf32> to vector<2x64xf32>
    %197 = vector.extract_strided_slice %195 {offsets = [0, 64], sizes = [2, 64], strides = [1, 1]} : vector<2x128xf32> to vector<2x64xf32>
    %198 = vector.extract_strided_slice %183 {offsets = [0, 128], sizes = [2, 64], strides = [1, 1]} : vector<2x192xf32> to vector<2x64xf32>
    %199 = vector.extract_strided_slice %187 {offsets = [0, 128], sizes = [2, 64], strides = [1, 1]} : vector<2x192xf32> to vector<2x64xf32>
    %200 = arith.mulf %196, %199 : vector<2x64xf32>
    %201 = arith.addf %198, %200 : vector<2x64xf32>
    %202 = math.tanh %201 : vector<2x64xf32>
    %cst_43 = arith.constant 1.000000e+00 : f32
    %203 = vector.broadcast %cst_43 : f32 to vector<2x64xf32>
    %204 = arith.subf %203, %197 : vector<2x64xf32>
    %205 = arith.mulf %204, %202 : vector<2x64xf32>
    %206 = arith.mulf %197, %178 : vector<2x64xf32>
    %207 = arith.addf %205, %206 : vector<2x64xf32>
    %c7_i32_44 = arith.constant 7 : i32
    %208 = arith.subi %c7_i32_44, %c4_i32 : i32
    %209 = vector.broadcast %c4_i32 : i32 to vector<2x64xi32>
    %210 = vector.broadcast %208 : i32 to vector<2x64xi32>
    %211 = arith.select %14, %209, %210 : vector<2x64xi1>, vector<2x64xi32>
    %212 = vector.broadcast %0 : vector<2x1xi32> to vector<2x64xi32>
    %213 = arith.cmpi slt, %211, %212 : vector<2x64xi32>
    %214 = arith.extui %213 : vector<2x64xi1> to vector<2x64xi32>
    %215 = arith.sitofp %214 : vector<2x64xi32> to vector<2x64xf32>
    %216 = arith.subf %207, %178 : vector<2x64xf32>
    %217 = arith.mulf %215, %216 : vector<2x64xf32>
    %218 = arith.addf %178, %217 : vector<2x64xf32>
    %219 = arith.mulf %215, %207 : vector<2x64xf32>
    %220 = arith.addf %180, %219 : vector<2x64xf32>
    %c5_i32 = arith.constant 5 : i32
    %221 = arith.index_cast %c5_i32 : i32 to index
    %c0_45 = arith.constant 0 : index
    %c0_46 = arith.constant 0 : index
    %222 = vector.load %arg0[%221, %c0_45, %c0_46] : memref<8x2x192xf32, #tpu.memory_space<vmem>>, vector<1x2x192xf32>
    %223 = vector.shape_cast %222 : vector<1x2x192xf32> to vector<2x192xf32>
    %224 = arith.truncf %218 : vector<2x64xf32> to vector<2x64xbf16>
    %cst_47 = arith.constant dense<0.000000e+00> : vector<2x192xf32>
    %225 = tpu.matmul %224, %15, %cst_47 {dimension_numbers = #tpu.dot_dimension_numbers<[1], [0], [0], [1], [0, 0, 1, 1], [], []>} : vector<2x64xbf16>, vector<64x192xbf16>, vector<2x192xf32> -> vector<2x192xf32>
    %226 = vector.broadcast %16 : vector<1x192xf32> to vector<2x192xf32>
    %227 = arith.addf %225, %226 : vector<2x192xf32>
    %228 = vector.extract_strided_slice %223 {offsets = [0, 0], sizes = [2, 128], strides = [1, 1]} : vector<2x192xf32> to vector<2x128xf32>
    %229 = vector.extract_strided_slice %227 {offsets = [0, 0], sizes = [2, 128], strides = [1, 1]} : vector<2x192xf32> to vector<2x128xf32>
    %230 = arith.addf %228, %229 : vector<2x128xf32>
    %231 = arith.negf %230 : vector<2x128xf32>
    %232 = math.exp %231 : vector<2x128xf32>
    %cst_48 = arith.constant 1.000000e+00 : f32
    %233 = vector.broadcast %cst_48 : f32 to vector<2x128xf32>
    %234 = arith.addf %233, %232 : vector<2x128xf32>
    %235 = arith.divf %233, %234 : vector<2x128xf32>
    %236 = vector.extract_strided_slice %235 {offsets = [0, 0], sizes = [2, 64], strides = [1, 1]} : vector<2x128xf32> to vector<2x64xf32>
    %237 = vector.extract_strided_slice %235 {offsets = [0, 64], sizes = [2, 64], strides = [1, 1]} : vector<2x128xf32> to vector<2x64xf32>
    %238 = vector.extract_strided_slice %223 {offsets = [0, 128], sizes = [2, 64], strides = [1, 1]} : vector<2x192xf32> to vector<2x64xf32>
    %239 = vector.extract_strided_slice %227 {offsets = [0, 128], sizes = [2, 64], strides = [1, 1]} : vector<2x192xf32> to vector<2x64xf32>
    %240 = arith.mulf %236, %239 : vector<2x64xf32>
    %241 = arith.addf %238, %240 : vector<2x64xf32>
    %242 = math.tanh %241 : vector<2x64xf32>
    %cst_49 = arith.constant 1.000000e+00 : f32
    %243 = vector.broadcast %cst_49 : f32 to vector<2x64xf32>
    %244 = arith.subf %243, %237 : vector<2x64xf32>
    %245 = arith.mulf %244, %242 : vector<2x64xf32>
    %246 = arith.mulf %237, %218 : vector<2x64xf32>
    %247 = arith.addf %245, %246 : vector<2x64xf32>
    %c7_i32_50 = arith.constant 7 : i32
    %248 = arith.subi %c7_i32_50, %c5_i32 : i32
    %249 = vector.broadcast %c5_i32 : i32 to vector<2x64xi32>
    %250 = vector.broadcast %248 : i32 to vector<2x64xi32>
    %251 = arith.select %14, %249, %250 : vector<2x64xi1>, vector<2x64xi32>
    %252 = vector.broadcast %0 : vector<2x1xi32> to vector<2x64xi32>
    %253 = arith.cmpi slt, %251, %252 : vector<2x64xi32>
    %254 = arith.extui %253 : vector<2x64xi1> to vector<2x64xi32>
    %255 = arith.sitofp %254 : vector<2x64xi32> to vector<2x64xf32>
    %256 = arith.subf %247, %218 : vector<2x64xf32>
    %257 = arith.mulf %255, %256 : vector<2x64xf32>
    %258 = arith.addf %218, %257 : vector<2x64xf32>
    %259 = arith.mulf %255, %247 : vector<2x64xf32>
    %260 = arith.addf %220, %259 : vector<2x64xf32>
    %c6_i32 = arith.constant 6 : i32
    %261 = arith.index_cast %c6_i32 : i32 to index
    %c0_51 = arith.constant 0 : index
    %c0_52 = arith.constant 0 : index
    %262 = vector.load %arg0[%261, %c0_51, %c0_52] : memref<8x2x192xf32, #tpu.memory_space<vmem>>, vector<1x2x192xf32>
    %263 = vector.shape_cast %262 : vector<1x2x192xf32> to vector<2x192xf32>
    %264 = arith.truncf %258 : vector<2x64xf32> to vector<2x64xbf16>
    %cst_53 = arith.constant dense<0.000000e+00> : vector<2x192xf32>
    %265 = tpu.matmul %264, %15, %cst_53 {dimension_numbers = #tpu.dot_dimension_numbers<[1], [0], [0], [1], [0, 0, 1, 1], [], []>} : vector<2x64xbf16>, vector<64x192xbf16>, vector<2x192xf32> -> vector<2x192xf32>
    %266 = vector.broadcast %16 : vector<1x192xf32> to vector<2x192xf32>
    %267 = arith.addf %265, %266 : vector<2x192xf32>
    %268 = vector.extract_strided_slice %263 {offsets = [0, 0], sizes = [2, 128], strides = [1, 1]} : vector<2x192xf32> to vector<2x128xf32>
    %269 = vector.extract_strided_slice %267 {offsets = [0, 0], sizes = [2, 128], strides = [1, 1]} : vector<2x192xf32> to vector<2x128xf32>
    %270 = arith.addf %268, %269 : vector<2x128xf32>
    %271 = arith.negf %270 : vector<2x128xf32>
    %272 = math.exp %271 : vector<2x128xf32>
    %cst_54 = arith.constant 1.000000e+00 : f32
    %273 = vector.broadcast %cst_54 : f32 to vector<2x128xf32>
    %274 = arith.addf %273, %272 : vector<2x128xf32>
    %275 = arith.divf %273, %274 : vector<2x128xf32>
    %276 = vector.extract_strided_slice %275 {offsets = [0, 0], sizes = [2, 64], strides = [1, 1]} : vector<2x128xf32> to vector<2x64xf32>
    %277 = vector.extract_strided_slice %275 {offsets = [0, 64], sizes = [2, 64], strides = [1, 1]} : vector<2x128xf32> to vector<2x64xf32>
    %278 = vector.extract_strided_slice %263 {offsets = [0, 128], sizes = [2, 64], strides = [1, 1]} : vector<2x192xf32> to vector<2x64xf32>
    %279 = vector.extract_strided_slice %267 {offsets = [0, 128], sizes = [2, 64], strides = [1, 1]} : vector<2x192xf32> to vector<2x64xf32>
    %280 = arith.mulf %276, %279 : vector<2x64xf32>
    %281 = arith.addf %278, %280 : vector<2x64xf32>
    %282 = math.tanh %281 : vector<2x64xf32>
    %cst_55 = arith.constant 1.000000e+00 : f32
    %283 = vector.broadcast %cst_55 : f32 to vector<2x64xf32>
    %284 = arith.subf %283, %277 : vector<2x64xf32>
    %285 = arith.mulf %284, %282 : vector<2x64xf32>
    %286 = arith.mulf %277, %258 : vector<2x64xf32>
    %287 = arith.addf %285, %286 : vector<2x64xf32>
    %c7_i32_56 = arith.constant 7 : i32
    %288 = arith.subi %c7_i32_56, %c6_i32 : i32
    %289 = vector.broadcast %c6_i32 : i32 to vector<2x64xi32>
    %290 = vector.broadcast %288 : i32 to vector<2x64xi32>
    %291 = arith.select %14, %289, %290 : vector<2x64xi1>, vector<2x64xi32>
    %292 = vector.broadcast %0 : vector<2x1xi32> to vector<2x64xi32>
    %293 = arith.cmpi slt, %291, %292 : vector<2x64xi32>
    %294 = arith.extui %293 : vector<2x64xi1> to vector<2x64xi32>
    %295 = arith.sitofp %294 : vector<2x64xi32> to vector<2x64xf32>
    %296 = arith.subf %287, %258 : vector<2x64xf32>
    %297 = arith.mulf %295, %296 : vector<2x64xf32>
    %298 = arith.addf %258, %297 : vector<2x64xf32>
    %299 = arith.mulf %295, %287 : vector<2x64xf32>
    %300 = arith.addf %260, %299 : vector<2x64xf32>
    %c7_i32_57 = arith.constant 7 : i32
    %301 = arith.index_cast %c7_i32_57 : i32 to index
    %c0_58 = arith.constant 0 : index
    %c0_59 = arith.constant 0 : index
    %302 = vector.load %arg0[%301, %c0_58, %c0_59] : memref<8x2x192xf32, #tpu.memory_space<vmem>>, vector<1x2x192xf32>
    %303 = vector.shape_cast %302 : vector<1x2x192xf32> to vector<2x192xf32>
    %304 = arith.truncf %298 : vector<2x64xf32> to vector<2x64xbf16>
    %cst_60 = arith.constant dense<0.000000e+00> : vector<2x192xf32>
    %305 = tpu.matmul %304, %15, %cst_60 {dimension_numbers = #tpu.dot_dimension_numbers<[1], [0], [0], [1], [0, 0, 1, 1], [], []>} : vector<2x64xbf16>, vector<64x192xbf16>, vector<2x192xf32> -> vector<2x192xf32>
    %306 = vector.broadcast %16 : vector<1x192xf32> to vector<2x192xf32>
    %307 = arith.addf %305, %306 : vector<2x192xf32>
    %308 = vector.extract_strided_slice %303 {offsets = [0, 0], sizes = [2, 128], strides = [1, 1]} : vector<2x192xf32> to vector<2x128xf32>
    %309 = vector.extract_strided_slice %307 {offsets = [0, 0], sizes = [2, 128], strides = [1, 1]} : vector<2x192xf32> to vector<2x128xf32>
    %310 = arith.addf %308, %309 : vector<2x128xf32>
    %311 = arith.negf %310 : vector<2x128xf32>
    %312 = math.exp %311 : vector<2x128xf32>
    %cst_61 = arith.constant 1.000000e+00 : f32
    %313 = vector.broadcast %cst_61 : f32 to vector<2x128xf32>
    %314 = arith.addf %313, %312 : vector<2x128xf32>
    %315 = arith.divf %313, %314 : vector<2x128xf32>
    %316 = vector.extract_strided_slice %315 {offsets = [0, 0], sizes = [2, 64], strides = [1, 1]} : vector<2x128xf32> to vector<2x64xf32>
    %317 = vector.extract_strided_slice %315 {offsets = [0, 64], sizes = [2, 64], strides = [1, 1]} : vector<2x128xf32> to vector<2x64xf32>
    %318 = vector.extract_strided_slice %303 {offsets = [0, 128], sizes = [2, 64], strides = [1, 1]} : vector<2x192xf32> to vector<2x64xf32>
    %319 = vector.extract_strided_slice %307 {offsets = [0, 128], sizes = [2, 64], strides = [1, 1]} : vector<2x192xf32> to vector<2x64xf32>
    %320 = arith.mulf %316, %319 : vector<2x64xf32>
    %321 = arith.addf %318, %320 : vector<2x64xf32>
    %322 = math.tanh %321 : vector<2x64xf32>
    %cst_62 = arith.constant 1.000000e+00 : f32
    %323 = vector.broadcast %cst_62 : f32 to vector<2x64xf32>
    %324 = arith.subf %323, %317 : vector<2x64xf32>
    %325 = arith.mulf %324, %322 : vector<2x64xf32>
    %326 = arith.mulf %317, %298 : vector<2x64xf32>
    %327 = arith.addf %325, %326 : vector<2x64xf32>
    %c7_i32_63 = arith.constant 7 : i32
    %328 = arith.subi %c7_i32_63, %c7_i32_57 : i32
    %329 = vector.broadcast %c7_i32_57 : i32 to vector<2x64xi32>
    %330 = vector.broadcast %328 : i32 to vector<2x64xi32>
    %331 = arith.select %14, %329, %330 : vector<2x64xi1>, vector<2x64xi32>
    %332 = vector.broadcast %0 : vector<2x1xi32> to vector<2x64xi32>
    %333 = arith.cmpi slt, %331, %332 : vector<2x64xi32>
    %334 = arith.extui %333 : vector<2x64xi1> to vector<2x64xi32>
    %335 = arith.sitofp %334 : vector<2x64xi32> to vector<2x64xf32>
    %336 = arith.subf %327, %298 : vector<2x64xf32>
    %337 = arith.mulf %335, %336 : vector<2x64xf32>
    %338 = arith.addf %298, %337 : vector<2x64xf32>
    %339 = arith.mulf %335, %327 : vector<2x64xf32>
    %340 = arith.addf %300, %339 : vector<2x64xf32>
    %c8_i32 = arith.constant 8 : i32
    %cst_64 = arith.constant 0.000000e+00 : f32
    %341 = vector.broadcast %cst_64 : f32 to vector<2x64xf32>
    %c0_i32_65 = arith.constant 0 : i32
    %342 = arith.index_cast %c0_i32_65 : i32 to index
    %c0_66 = arith.constant 0 : index
    %c0_67 = arith.constant 0 : index
    %343 = vector.load %arg1[%342, %c0_66, %c0_67] : memref<8x2x192xf32, #tpu.memory_space<vmem>>, vector<1x2x192xf32>
    %344 = vector.shape_cast %343 : vector<1x2x192xf32> to vector<2x192xf32>
    %345 = arith.truncf %338 : vector<2x64xf32> to vector<2x64xbf16>
    %cst_68 = arith.constant dense<0.000000e+00> : vector<2x192xf32>
    %346 = tpu.matmul %345, %17, %cst_68 {dimension_numbers = #tpu.dot_dimension_numbers<[1], [0], [0], [1], [0, 0, 1, 1], [], []>} : vector<2x64xbf16>, vector<64x192xbf16>, vector<2x192xf32> -> vector<2x192xf32>
    %347 = vector.broadcast %18 : vector<1x192xf32> to vector<2x192xf32>
    %348 = arith.addf %346, %347 : vector<2x192xf32>
    %349 = vector.extract_strided_slice %344 {offsets = [0, 0], sizes = [2, 128], strides = [1, 1]} : vector<2x192xf32> to vector<2x128xf32>
    %350 = vector.extract_strided_slice %348 {offsets = [0, 0], sizes = [2, 128], strides = [1, 1]} : vector<2x192xf32> to vector<2x128xf32>
    %351 = arith.addf %349, %350 : vector<2x128xf32>
    %352 = arith.negf %351 : vector<2x128xf32>
    %353 = math.exp %352 : vector<2x128xf32>
    %cst_69 = arith.constant 1.000000e+00 : f32
    %354 = vector.broadcast %cst_69 : f32 to vector<2x128xf32>
    %355 = arith.addf %354, %353 : vector<2x128xf32>
    %356 = arith.divf %354, %355 : vector<2x128xf32>
    %357 = vector.extract_strided_slice %356 {offsets = [0, 0], sizes = [2, 64], strides = [1, 1]} : vector<2x128xf32> to vector<2x64xf32>
    %358 = vector.extract_strided_slice %356 {offsets = [0, 64], sizes = [2, 64], strides = [1, 1]} : vector<2x128xf32> to vector<2x64xf32>
    %359 = vector.extract_strided_slice %344 {offsets = [0, 128], sizes = [2, 64], strides = [1, 1]} : vector<2x192xf32> to vector<2x64xf32>
    %360 = vector.extract_strided_slice %348 {offsets = [0, 128], sizes = [2, 64], strides = [1, 1]} : vector<2x192xf32> to vector<2x64xf32>
    %361 = arith.mulf %357, %360 : vector<2x64xf32>
    %362 = arith.addf %359, %361 : vector<2x64xf32>
    %363 = math.tanh %362 : vector<2x64xf32>
    %cst_70 = arith.constant 1.000000e+00 : f32
    %364 = vector.broadcast %cst_70 : f32 to vector<2x64xf32>
    %365 = arith.subf %364, %358 : vector<2x64xf32>
    %366 = arith.mulf %365, %363 : vector<2x64xf32>
    %367 = arith.mulf %358, %338 : vector<2x64xf32>
    %368 = arith.addf %366, %367 : vector<2x64xf32>
    %c7_i32_71 = arith.constant 7 : i32
    %369 = arith.subi %c7_i32_71, %c0_i32_65 : i32
    %370 = vector.broadcast %c0_i32_65 : i32 to vector<2x64xi32>
    %371 = vector.broadcast %369 : i32 to vector<2x64xi32>
    %372 = arith.select %14, %370, %371 : vector<2x64xi1>, vector<2x64xi32>
    %373 = vector.broadcast %1 : vector<2x1xi32> to vector<2x64xi32>
    %374 = arith.cmpi slt, %372, %373 : vector<2x64xi32>
    %375 = arith.extui %374 : vector<2x64xi1> to vector<2x64xi32>
    %376 = arith.sitofp %375 : vector<2x64xi32> to vector<2x64xf32>
    %377 = arith.subf %368, %338 : vector<2x64xf32>
    %378 = arith.mulf %376, %377 : vector<2x64xf32>
    %379 = arith.addf %338, %378 : vector<2x64xf32>
    %380 = arith.mulf %376, %368 : vector<2x64xf32>
    %381 = arith.addf %341, %380 : vector<2x64xf32>
    %c1_i32_72 = arith.constant 1 : i32
    %382 = arith.index_cast %c1_i32_72 : i32 to index
    %c0_73 = arith.constant 0 : index
    %c0_74 = arith.constant 0 : index
    %383 = vector.load %arg1[%382, %c0_73, %c0_74] : memref<8x2x192xf32, #tpu.memory_space<vmem>>, vector<1x2x192xf32>
    %384 = vector.shape_cast %383 : vector<1x2x192xf32> to vector<2x192xf32>
    %385 = arith.truncf %379 : vector<2x64xf32> to vector<2x64xbf16>
    %cst_75 = arith.constant dense<0.000000e+00> : vector<2x192xf32>
    %386 = tpu.matmul %385, %17, %cst_75 {dimension_numbers = #tpu.dot_dimension_numbers<[1], [0], [0], [1], [0, 0, 1, 1], [], []>} : vector<2x64xbf16>, vector<64x192xbf16>, vector<2x192xf32> -> vector<2x192xf32>
    %387 = vector.broadcast %18 : vector<1x192xf32> to vector<2x192xf32>
    %388 = arith.addf %386, %387 : vector<2x192xf32>
    %389 = vector.extract_strided_slice %384 {offsets = [0, 0], sizes = [2, 128], strides = [1, 1]} : vector<2x192xf32> to vector<2x128xf32>
    %390 = vector.extract_strided_slice %388 {offsets = [0, 0], sizes = [2, 128], strides = [1, 1]} : vector<2x192xf32> to vector<2x128xf32>
    %391 = arith.addf %389, %390 : vector<2x128xf32>
    %392 = arith.negf %391 : vector<2x128xf32>
    %393 = math.exp %392 : vector<2x128xf32>
    %cst_76 = arith.constant 1.000000e+00 : f32
    %394 = vector.broadcast %cst_76 : f32 to vector<2x128xf32>
    %395 = arith.addf %394, %393 : vector<2x128xf32>
    %396 = arith.divf %394, %395 : vector<2x128xf32>
    %397 = vector.extract_strided_slice %396 {offsets = [0, 0], sizes = [2, 64], strides = [1, 1]} : vector<2x128xf32> to vector<2x64xf32>
    %398 = vector.extract_strided_slice %396 {offsets = [0, 64], sizes = [2, 64], strides = [1, 1]} : vector<2x128xf32> to vector<2x64xf32>
    %399 = vector.extract_strided_slice %384 {offsets = [0, 128], sizes = [2, 64], strides = [1, 1]} : vector<2x192xf32> to vector<2x64xf32>
    %400 = vector.extract_strided_slice %388 {offsets = [0, 128], sizes = [2, 64], strides = [1, 1]} : vector<2x192xf32> to vector<2x64xf32>
    %401 = arith.mulf %397, %400 : vector<2x64xf32>
    %402 = arith.addf %399, %401 : vector<2x64xf32>
    %403 = math.tanh %402 : vector<2x64xf32>
    %cst_77 = arith.constant 1.000000e+00 : f32
    %404 = vector.broadcast %cst_77 : f32 to vector<2x64xf32>
    %405 = arith.subf %404, %398 : vector<2x64xf32>
    %406 = arith.mulf %405, %403 : vector<2x64xf32>
    %407 = arith.mulf %398, %379 : vector<2x64xf32>
    %408 = arith.addf %406, %407 : vector<2x64xf32>
    %c7_i32_78 = arith.constant 7 : i32
    %409 = arith.subi %c7_i32_78, %c1_i32_72 : i32
    %410 = vector.broadcast %c1_i32_72 : i32 to vector<2x64xi32>
    %411 = vector.broadcast %409 : i32 to vector<2x64xi32>
    %412 = arith.select %14, %410, %411 : vector<2x64xi1>, vector<2x64xi32>
    %413 = vector.broadcast %1 : vector<2x1xi32> to vector<2x64xi32>
    %414 = arith.cmpi slt, %412, %413 : vector<2x64xi32>
    %415 = arith.extui %414 : vector<2x64xi1> to vector<2x64xi32>
    %416 = arith.sitofp %415 : vector<2x64xi32> to vector<2x64xf32>
    %417 = arith.subf %408, %379 : vector<2x64xf32>
    %418 = arith.mulf %416, %417 : vector<2x64xf32>
    %419 = arith.addf %379, %418 : vector<2x64xf32>
    %420 = arith.mulf %416, %408 : vector<2x64xf32>
    %421 = arith.addf %381, %420 : vector<2x64xf32>
    %c2_i32_79 = arith.constant 2 : i32
    %422 = arith.index_cast %c2_i32_79 : i32 to index
    %c0_80 = arith.constant 0 : index
    %c0_81 = arith.constant 0 : index
    %423 = vector.load %arg1[%422, %c0_80, %c0_81] : memref<8x2x192xf32, #tpu.memory_space<vmem>>, vector<1x2x192xf32>
    %424 = vector.shape_cast %423 : vector<1x2x192xf32> to vector<2x192xf32>
    %425 = arith.truncf %419 : vector<2x64xf32> to vector<2x64xbf16>
    %cst_82 = arith.constant dense<0.000000e+00> : vector<2x192xf32>
    %426 = tpu.matmul %425, %17, %cst_82 {dimension_numbers = #tpu.dot_dimension_numbers<[1], [0], [0], [1], [0, 0, 1, 1], [], []>} : vector<2x64xbf16>, vector<64x192xbf16>, vector<2x192xf32> -> vector<2x192xf32>
    %427 = vector.broadcast %18 : vector<1x192xf32> to vector<2x192xf32>
    %428 = arith.addf %426, %427 : vector<2x192xf32>
    %429 = vector.extract_strided_slice %424 {offsets = [0, 0], sizes = [2, 128], strides = [1, 1]} : vector<2x192xf32> to vector<2x128xf32>
    %430 = vector.extract_strided_slice %428 {offsets = [0, 0], sizes = [2, 128], strides = [1, 1]} : vector<2x192xf32> to vector<2x128xf32>
    %431 = arith.addf %429, %430 : vector<2x128xf32>
    %432 = arith.negf %431 : vector<2x128xf32>
    %433 = math.exp %432 : vector<2x128xf32>
    %cst_83 = arith.constant 1.000000e+00 : f32
    %434 = vector.broadcast %cst_83 : f32 to vector<2x128xf32>
    %435 = arith.addf %434, %433 : vector<2x128xf32>
    %436 = arith.divf %434, %435 : vector<2x128xf32>
    %437 = vector.extract_strided_slice %436 {offsets = [0, 0], sizes = [2, 64], strides = [1, 1]} : vector<2x128xf32> to vector<2x64xf32>
    %438 = vector.extract_strided_slice %436 {offsets = [0, 64], sizes = [2, 64], strides = [1, 1]} : vector<2x128xf32> to vector<2x64xf32>
    %439 = vector.extract_strided_slice %424 {offsets = [0, 128], sizes = [2, 64], strides = [1, 1]} : vector<2x192xf32> to vector<2x64xf32>
    %440 = vector.extract_strided_slice %428 {offsets = [0, 128], sizes = [2, 64], strides = [1, 1]} : vector<2x192xf32> to vector<2x64xf32>
    %441 = arith.mulf %437, %440 : vector<2x64xf32>
    %442 = arith.addf %439, %441 : vector<2x64xf32>
    %443 = math.tanh %442 : vector<2x64xf32>
    %cst_84 = arith.constant 1.000000e+00 : f32
    %444 = vector.broadcast %cst_84 : f32 to vector<2x64xf32>
    %445 = arith.subf %444, %438 : vector<2x64xf32>
    %446 = arith.mulf %445, %443 : vector<2x64xf32>
    %447 = arith.mulf %438, %419 : vector<2x64xf32>
    %448 = arith.addf %446, %447 : vector<2x64xf32>
    %c7_i32_85 = arith.constant 7 : i32
    %449 = arith.subi %c7_i32_85, %c2_i32_79 : i32
    %450 = vector.broadcast %c2_i32_79 : i32 to vector<2x64xi32>
    %451 = vector.broadcast %449 : i32 to vector<2x64xi32>
    %452 = arith.select %14, %450, %451 : vector<2x64xi1>, vector<2x64xi32>
    %453 = vector.broadcast %1 : vector<2x1xi32> to vector<2x64xi32>
    %454 = arith.cmpi slt, %452, %453 : vector<2x64xi32>
    %455 = arith.extui %454 : vector<2x64xi1> to vector<2x64xi32>
    %456 = arith.sitofp %455 : vector<2x64xi32> to vector<2x64xf32>
    %457 = arith.subf %448, %419 : vector<2x64xf32>
    %458 = arith.mulf %456, %457 : vector<2x64xf32>
    %459 = arith.addf %419, %458 : vector<2x64xf32>
    %460 = arith.mulf %456, %448 : vector<2x64xf32>
    %461 = arith.addf %421, %460 : vector<2x64xf32>
    %c3_i32_86 = arith.constant 3 : i32
    %462 = arith.index_cast %c3_i32_86 : i32 to index
    %c0_87 = arith.constant 0 : index
    %c0_88 = arith.constant 0 : index
    %463 = vector.load %arg1[%462, %c0_87, %c0_88] : memref<8x2x192xf32, #tpu.memory_space<vmem>>, vector<1x2x192xf32>
    %464 = vector.shape_cast %463 : vector<1x2x192xf32> to vector<2x192xf32>
    %465 = arith.truncf %459 : vector<2x64xf32> to vector<2x64xbf16>
    %cst_89 = arith.constant dense<0.000000e+00> : vector<2x192xf32>
    %466 = tpu.matmul %465, %17, %cst_89 {dimension_numbers = #tpu.dot_dimension_numbers<[1], [0], [0], [1], [0, 0, 1, 1], [], []>} : vector<2x64xbf16>, vector<64x192xbf16>, vector<2x192xf32> -> vector<2x192xf32>
    %467 = vector.broadcast %18 : vector<1x192xf32> to vector<2x192xf32>
    %468 = arith.addf %466, %467 : vector<2x192xf32>
    %469 = vector.extract_strided_slice %464 {offsets = [0, 0], sizes = [2, 128], strides = [1, 1]} : vector<2x192xf32> to vector<2x128xf32>
    %470 = vector.extract_strided_slice %468 {offsets = [0, 0], sizes = [2, 128], strides = [1, 1]} : vector<2x192xf32> to vector<2x128xf32>
    %471 = arith.addf %469, %470 : vector<2x128xf32>
    %472 = arith.negf %471 : vector<2x128xf32>
    %473 = math.exp %472 : vector<2x128xf32>
    %cst_90 = arith.constant 1.000000e+00 : f32
    %474 = vector.broadcast %cst_90 : f32 to vector<2x128xf32>
    %475 = arith.addf %474, %473 : vector<2x128xf32>
    %476 = arith.divf %474, %475 : vector<2x128xf32>
    %477 = vector.extract_strided_slice %476 {offsets = [0, 0], sizes = [2, 64], strides = [1, 1]} : vector<2x128xf32> to vector<2x64xf32>
    %478 = vector.extract_strided_slice %476 {offsets = [0, 64], sizes = [2, 64], strides = [1, 1]} : vector<2x128xf32> to vector<2x64xf32>
    %479 = vector.extract_strided_slice %464 {offsets = [0, 128], sizes = [2, 64], strides = [1, 1]} : vector<2x192xf32> to vector<2x64xf32>
    %480 = vector.extract_strided_slice %468 {offsets = [0, 128], sizes = [2, 64], strides = [1, 1]} : vector<2x192xf32> to vector<2x64xf32>
    %481 = arith.mulf %477, %480 : vector<2x64xf32>
    %482 = arith.addf %479, %481 : vector<2x64xf32>
    %483 = math.tanh %482 : vector<2x64xf32>
    %cst_91 = arith.constant 1.000000e+00 : f32
    %484 = vector.broadcast %cst_91 : f32 to vector<2x64xf32>
    %485 = arith.subf %484, %478 : vector<2x64xf32>
    %486 = arith.mulf %485, %483 : vector<2x64xf32>
    %487 = arith.mulf %478, %459 : vector<2x64xf32>
    %488 = arith.addf %486, %487 : vector<2x64xf32>
    %c7_i32_92 = arith.constant 7 : i32
    %489 = arith.subi %c7_i32_92, %c3_i32_86 : i32
    %490 = vector.broadcast %c3_i32_86 : i32 to vector<2x64xi32>
    %491 = vector.broadcast %489 : i32 to vector<2x64xi32>
    %492 = arith.select %14, %490, %491 : vector<2x64xi1>, vector<2x64xi32>
    %493 = vector.broadcast %1 : vector<2x1xi32> to vector<2x64xi32>
    %494 = arith.cmpi slt, %492, %493 : vector<2x64xi32>
    %495 = arith.extui %494 : vector<2x64xi1> to vector<2x64xi32>
    %496 = arith.sitofp %495 : vector<2x64xi32> to vector<2x64xf32>
    %497 = arith.subf %488, %459 : vector<2x64xf32>
    %498 = arith.mulf %496, %497 : vector<2x64xf32>
    %499 = arith.addf %459, %498 : vector<2x64xf32>
    %500 = arith.mulf %496, %488 : vector<2x64xf32>
    %501 = arith.addf %461, %500 : vector<2x64xf32>
    %c4_i32_93 = arith.constant 4 : i32
    %502 = arith.index_cast %c4_i32_93 : i32 to index
    %c0_94 = arith.constant 0 : index
    %c0_95 = arith.constant 0 : index
    %503 = vector.load %arg1[%502, %c0_94, %c0_95] : memref<8x2x192xf32, #tpu.memory_space<vmem>>, vector<1x2x192xf32>
    %504 = vector.shape_cast %503 : vector<1x2x192xf32> to vector<2x192xf32>
    %505 = arith.truncf %499 : vector<2x64xf32> to vector<2x64xbf16>
    %cst_96 = arith.constant dense<0.000000e+00> : vector<2x192xf32>
    %506 = tpu.matmul %505, %17, %cst_96 {dimension_numbers = #tpu.dot_dimension_numbers<[1], [0], [0], [1], [0, 0, 1, 1], [], []>} : vector<2x64xbf16>, vector<64x192xbf16>, vector<2x192xf32> -> vector<2x192xf32>
    %507 = vector.broadcast %18 : vector<1x192xf32> to vector<2x192xf32>
    %508 = arith.addf %506, %507 : vector<2x192xf32>
    %509 = vector.extract_strided_slice %504 {offsets = [0, 0], sizes = [2, 128], strides = [1, 1]} : vector<2x192xf32> to vector<2x128xf32>
    %510 = vector.extract_strided_slice %508 {offsets = [0, 0], sizes = [2, 128], strides = [1, 1]} : vector<2x192xf32> to vector<2x128xf32>
    %511 = arith.addf %509, %510 : vector<2x128xf32>
    %512 = arith.negf %511 : vector<2x128xf32>
    %513 = math.exp %512 : vector<2x128xf32>
    %cst_97 = arith.constant 1.000000e+00 : f32
    %514 = vector.broadcast %cst_97 : f32 to vector<2x128xf32>
    %515 = arith.addf %514, %513 : vector<2x128xf32>
    %516 = arith.divf %514, %515 : vector<2x128xf32>
    %517 = vector.extract_strided_slice %516 {offsets = [0, 0], sizes = [2, 64], strides = [1, 1]} : vector<2x128xf32> to vector<2x64xf32>
    %518 = vector.extract_strided_slice %516 {offsets = [0, 64], sizes = [2, 64], strides = [1, 1]} : vector<2x128xf32> to vector<2x64xf32>
    %519 = vector.extract_strided_slice %504 {offsets = [0, 128], sizes = [2, 64], strides = [1, 1]} : vector<2x192xf32> to vector<2x64xf32>
    %520 = vector.extract_strided_slice %508 {offsets = [0, 128], sizes = [2, 64], strides = [1, 1]} : vector<2x192xf32> to vector<2x64xf32>
    %521 = arith.mulf %517, %520 : vector<2x64xf32>
    %522 = arith.addf %519, %521 : vector<2x64xf32>
    %523 = math.tanh %522 : vector<2x64xf32>
    %cst_98 = arith.constant 1.000000e+00 : f32
    %524 = vector.broadcast %cst_98 : f32 to vector<2x64xf32>
    %525 = arith.subf %524, %518 : vector<2x64xf32>
    %526 = arith.mulf %525, %523 : vector<2x64xf32>
    %527 = arith.mulf %518, %499 : vector<2x64xf32>
    %528 = arith.addf %526, %527 : vector<2x64xf32>
    %c7_i32_99 = arith.constant 7 : i32
    %529 = arith.subi %c7_i32_99, %c4_i32_93 : i32
    %530 = vector.broadcast %c4_i32_93 : i32 to vector<2x64xi32>
    %531 = vector.broadcast %529 : i32 to vector<2x64xi32>
    %532 = arith.select %14, %530, %531 : vector<2x64xi1>, vector<2x64xi32>
    %533 = vector.broadcast %1 : vector<2x1xi32> to vector<2x64xi32>
    %534 = arith.cmpi slt, %532, %533 : vector<2x64xi32>
    %535 = arith.extui %534 : vector<2x64xi1> to vector<2x64xi32>
    %536 = arith.sitofp %535 : vector<2x64xi32> to vector<2x64xf32>
    %537 = arith.subf %528, %499 : vector<2x64xf32>
    %538 = arith.mulf %536, %537 : vector<2x64xf32>
    %539 = arith.addf %499, %538 : vector<2x64xf32>
    %540 = arith.mulf %536, %528 : vector<2x64xf32>
    %541 = arith.addf %501, %540 : vector<2x64xf32>
    %c5_i32_100 = arith.constant 5 : i32
    %542 = arith.index_cast %c5_i32_100 : i32 to index
    %c0_101 = arith.constant 0 : index
    %c0_102 = arith.constant 0 : index
    %543 = vector.load %arg1[%542, %c0_101, %c0_102] : memref<8x2x192xf32, #tpu.memory_space<vmem>>, vector<1x2x192xf32>
    %544 = vector.shape_cast %543 : vector<1x2x192xf32> to vector<2x192xf32>
    %545 = arith.truncf %539 : vector<2x64xf32> to vector<2x64xbf16>
    %cst_103 = arith.constant dense<0.000000e+00> : vector<2x192xf32>
    %546 = tpu.matmul %545, %17, %cst_103 {dimension_numbers = #tpu.dot_dimension_numbers<[1], [0], [0], [1], [0, 0, 1, 1], [], []>} : vector<2x64xbf16>, vector<64x192xbf16>, vector<2x192xf32> -> vector<2x192xf32>
    %547 = vector.broadcast %18 : vector<1x192xf32> to vector<2x192xf32>
    %548 = arith.addf %546, %547 : vector<2x192xf32>
    %549 = vector.extract_strided_slice %544 {offsets = [0, 0], sizes = [2, 128], strides = [1, 1]} : vector<2x192xf32> to vector<2x128xf32>
    %550 = vector.extract_strided_slice %548 {offsets = [0, 0], sizes = [2, 128], strides = [1, 1]} : vector<2x192xf32> to vector<2x128xf32>
    %551 = arith.addf %549, %550 : vector<2x128xf32>
    %552 = arith.negf %551 : vector<2x128xf32>
    %553 = math.exp %552 : vector<2x128xf32>
    %cst_104 = arith.constant 1.000000e+00 : f32
    %554 = vector.broadcast %cst_104 : f32 to vector<2x128xf32>
    %555 = arith.addf %554, %553 : vector<2x128xf32>
    %556 = arith.divf %554, %555 : vector<2x128xf32>
    %557 = vector.extract_strided_slice %556 {offsets = [0, 0], sizes = [2, 64], strides = [1, 1]} : vector<2x128xf32> to vector<2x64xf32>
    %558 = vector.extract_strided_slice %556 {offsets = [0, 64], sizes = [2, 64], strides = [1, 1]} : vector<2x128xf32> to vector<2x64xf32>
    %559 = vector.extract_strided_slice %544 {offsets = [0, 128], sizes = [2, 64], strides = [1, 1]} : vector<2x192xf32> to vector<2x64xf32>
    %560 = vector.extract_strided_slice %548 {offsets = [0, 128], sizes = [2, 64], strides = [1, 1]} : vector<2x192xf32> to vector<2x64xf32>
    %561 = arith.mulf %557, %560 : vector<2x64xf32>
    %562 = arith.addf %559, %561 : vector<2x64xf32>
    %563 = math.tanh %562 : vector<2x64xf32>
    %cst_105 = arith.constant 1.000000e+00 : f32
    %564 = vector.broadcast %cst_105 : f32 to vector<2x64xf32>
    %565 = arith.subf %564, %558 : vector<2x64xf32>
    %566 = arith.mulf %565, %563 : vector<2x64xf32>
    %567 = arith.mulf %558, %539 : vector<2x64xf32>
    %568 = arith.addf %566, %567 : vector<2x64xf32>
    %c7_i32_106 = arith.constant 7 : i32
    %569 = arith.subi %c7_i32_106, %c5_i32_100 : i32
    %570 = vector.broadcast %c5_i32_100 : i32 to vector<2x64xi32>
    %571 = vector.broadcast %569 : i32 to vector<2x64xi32>
    %572 = arith.select %14, %570, %571 : vector<2x64xi1>, vector<2x64xi32>
    %573 = vector.broadcast %1 : vector<2x1xi32> to vector<2x64xi32>
    %574 = arith.cmpi slt, %572, %573 : vector<2x64xi32>
    %575 = arith.extui %574 : vector<2x64xi1> to vector<2x64xi32>
    %576 = arith.sitofp %575 : vector<2x64xi32> to vector<2x64xf32>
    %577 = arith.subf %568, %539 : vector<2x64xf32>
    %578 = arith.mulf %576, %577 : vector<2x64xf32>
    %579 = arith.addf %539, %578 : vector<2x64xf32>
    %580 = arith.mulf %576, %568 : vector<2x64xf32>
    %581 = arith.addf %541, %580 : vector<2x64xf32>
    %c6_i32_107 = arith.constant 6 : i32
    %582 = arith.index_cast %c6_i32_107 : i32 to index
    %c0_108 = arith.constant 0 : index
    %c0_109 = arith.constant 0 : index
    %583 = vector.load %arg1[%582, %c0_108, %c0_109] : memref<8x2x192xf32, #tpu.memory_space<vmem>>, vector<1x2x192xf32>
    %584 = vector.shape_cast %583 : vector<1x2x192xf32> to vector<2x192xf32>
    %585 = arith.truncf %579 : vector<2x64xf32> to vector<2x64xbf16>
    %cst_110 = arith.constant dense<0.000000e+00> : vector<2x192xf32>
    %586 = tpu.matmul %585, %17, %cst_110 {dimension_numbers = #tpu.dot_dimension_numbers<[1], [0], [0], [1], [0, 0, 1, 1], [], []>} : vector<2x64xbf16>, vector<64x192xbf16>, vector<2x192xf32> -> vector<2x192xf32>
    %587 = vector.broadcast %18 : vector<1x192xf32> to vector<2x192xf32>
    %588 = arith.addf %586, %587 : vector<2x192xf32>
    %589 = vector.extract_strided_slice %584 {offsets = [0, 0], sizes = [2, 128], strides = [1, 1]} : vector<2x192xf32> to vector<2x128xf32>
    %590 = vector.extract_strided_slice %588 {offsets = [0, 0], sizes = [2, 128], strides = [1, 1]} : vector<2x192xf32> to vector<2x128xf32>
    %591 = arith.addf %589, %590 : vector<2x128xf32>
    %592 = arith.negf %591 : vector<2x128xf32>
    %593 = math.exp %592 : vector<2x128xf32>
    %cst_111 = arith.constant 1.000000e+00 : f32
    %594 = vector.broadcast %cst_111 : f32 to vector<2x128xf32>
    %595 = arith.addf %594, %593 : vector<2x128xf32>
    %596 = arith.divf %594, %595 : vector<2x128xf32>
    %597 = vector.extract_strided_slice %596 {offsets = [0, 0], sizes = [2, 64], strides = [1, 1]} : vector<2x128xf32> to vector<2x64xf32>
    %598 = vector.extract_strided_slice %596 {offsets = [0, 64], sizes = [2, 64], strides = [1, 1]} : vector<2x128xf32> to vector<2x64xf32>
    %599 = vector.extract_strided_slice %584 {offsets = [0, 128], sizes = [2, 64], strides = [1, 1]} : vector<2x192xf32> to vector<2x64xf32>
    %600 = vector.extract_strided_slice %588 {offsets = [0, 128], sizes = [2, 64], strides = [1, 1]} : vector<2x192xf32> to vector<2x64xf32>
    %601 = arith.mulf %597, %600 : vector<2x64xf32>
    %602 = arith.addf %599, %601 : vector<2x64xf32>
    %603 = math.tanh %602 : vector<2x64xf32>
    %cst_112 = arith.constant 1.000000e+00 : f32
    %604 = vector.broadcast %cst_112 : f32 to vector<2x64xf32>
    %605 = arith.subf %604, %598 : vector<2x64xf32>
    %606 = arith.mulf %605, %603 : vector<2x64xf32>
    %607 = arith.mulf %598, %579 : vector<2x64xf32>
    %608 = arith.addf %606, %607 : vector<2x64xf32>
    %c7_i32_113 = arith.constant 7 : i32
    %609 = arith.subi %c7_i32_113, %c6_i32_107 : i32
    %610 = vector.broadcast %c6_i32_107 : i32 to vector<2x64xi32>
    %611 = vector.broadcast %609 : i32 to vector<2x64xi32>
    %612 = arith.select %14, %610, %611 : vector<2x64xi1>, vector<2x64xi32>
    %613 = vector.broadcast %1 : vector<2x1xi32> to vector<2x64xi32>
    %614 = arith.cmpi slt, %612, %613 : vector<2x64xi32>
    %615 = arith.extui %614 : vector<2x64xi1> to vector<2x64xi32>
    %616 = arith.sitofp %615 : vector<2x64xi32> to vector<2x64xf32>
    %617 = arith.subf %608, %579 : vector<2x64xf32>
    %618 = arith.mulf %616, %617 : vector<2x64xf32>
    %619 = arith.addf %579, %618 : vector<2x64xf32>
    %620 = arith.mulf %616, %608 : vector<2x64xf32>
    %621 = arith.addf %581, %620 : vector<2x64xf32>
    %c7_i32_114 = arith.constant 7 : i32
    %622 = arith.index_cast %c7_i32_114 : i32 to index
    %c0_115 = arith.constant 0 : index
    %c0_116 = arith.constant 0 : index
    %623 = vector.load %arg1[%622, %c0_115, %c0_116] : memref<8x2x192xf32, #tpu.memory_space<vmem>>, vector<1x2x192xf32>
    %624 = vector.shape_cast %623 : vector<1x2x192xf32> to vector<2x192xf32>
    %625 = arith.truncf %619 : vector<2x64xf32> to vector<2x64xbf16>
    %cst_117 = arith.constant dense<0.000000e+00> : vector<2x192xf32>
    %626 = tpu.matmul %625, %17, %cst_117 {dimension_numbers = #tpu.dot_dimension_numbers<[1], [0], [0], [1], [0, 0, 1, 1], [], []>} : vector<2x64xbf16>, vector<64x192xbf16>, vector<2x192xf32> -> vector<2x192xf32>
    %627 = vector.broadcast %18 : vector<1x192xf32> to vector<2x192xf32>
    %628 = arith.addf %626, %627 : vector<2x192xf32>
    %629 = vector.extract_strided_slice %624 {offsets = [0, 0], sizes = [2, 128], strides = [1, 1]} : vector<2x192xf32> to vector<2x128xf32>
    %630 = vector.extract_strided_slice %628 {offsets = [0, 0], sizes = [2, 128], strides = [1, 1]} : vector<2x192xf32> to vector<2x128xf32>
    %631 = arith.addf %629, %630 : vector<2x128xf32>
    %632 = arith.negf %631 : vector<2x128xf32>
    %633 = math.exp %632 : vector<2x128xf32>
    %cst_118 = arith.constant 1.000000e+00 : f32
    %634 = vector.broadcast %cst_118 : f32 to vector<2x128xf32>
    %635 = arith.addf %634, %633 : vector<2x128xf32>
    %636 = arith.divf %634, %635 : vector<2x128xf32>
    %637 = vector.extract_strided_slice %636 {offsets = [0, 0], sizes = [2, 64], strides = [1, 1]} : vector<2x128xf32> to vector<2x64xf32>
    %638 = vector.extract_strided_slice %636 {offsets = [0, 64], sizes = [2, 64], strides = [1, 1]} : vector<2x128xf32> to vector<2x64xf32>
    %639 = vector.extract_strided_slice %624 {offsets = [0, 128], sizes = [2, 64], strides = [1, 1]} : vector<2x192xf32> to vector<2x64xf32>
    %640 = vector.extract_strided_slice %628 {offsets = [0, 128], sizes = [2, 64], strides = [1, 1]} : vector<2x192xf32> to vector<2x64xf32>
    %641 = arith.mulf %637, %640 : vector<2x64xf32>
    %642 = arith.addf %639, %641 : vector<2x64xf32>
    %643 = math.tanh %642 : vector<2x64xf32>
    %cst_119 = arith.constant 1.000000e+00 : f32
    %644 = vector.broadcast %cst_119 : f32 to vector<2x64xf32>
    %645 = arith.subf %644, %638 : vector<2x64xf32>
    %646 = arith.mulf %645, %643 : vector<2x64xf32>
    %647 = arith.mulf %638, %619 : vector<2x64xf32>
    %648 = arith.addf %646, %647 : vector<2x64xf32>
    %c7_i32_120 = arith.constant 7 : i32
    %649 = arith.subi %c7_i32_120, %c7_i32_114 : i32
    %650 = vector.broadcast %c7_i32_114 : i32 to vector<2x64xi32>
    %651 = vector.broadcast %649 : i32 to vector<2x64xi32>
    %652 = arith.select %14, %650, %651 : vector<2x64xi1>, vector<2x64xi32>
    %653 = vector.broadcast %1 : vector<2x1xi32> to vector<2x64xi32>
    %654 = arith.cmpi slt, %652, %653 : vector<2x64xi32>
    %655 = arith.extui %654 : vector<2x64xi1> to vector<2x64xi32>
    %656 = arith.sitofp %655 : vector<2x64xi32> to vector<2x64xf32>
    %657 = arith.subf %648, %619 : vector<2x64xf32>
    %658 = arith.mulf %656, %657 : vector<2x64xf32>
    %659 = arith.addf %619, %658 : vector<2x64xf32>
    %660 = arith.mulf %656, %648 : vector<2x64xf32>
    %661 = arith.addf %621, %660 : vector<2x64xf32>
    %c8_i32_121 = arith.constant 8 : i32
    %662 = vector.broadcast %6 : vector<2x1xf32> to vector<2x64xf32>
    %663 = arith.mulf %340, %662 : vector<2x64xf32>
    %664 = vector.broadcast %11 : vector<2x1xf32> to vector<2x64xf32>
    %665 = arith.mulf %661, %664 : vector<2x64xf32>
    %666 = tpu.concatenate %663, %665 in 1 : vector<2x64xf32>, vector<2x64xf32> -> vector<2x128xf32>
    %c0_122 = arith.constant 0 : index
    %c0_123 = arith.constant 0 : index
    %667 = vector.load %arg8[%c0_122, %c0_123] : memref<2x128xf32, #tpu.memory_space<vmem>>, vector<2x128xf32>
    tpu.vector_store %arg8[%c0_122, %c0_123], %666 {strides = array<i32>} : memref<2x128xf32, #tpu.memory_space<vmem>>, vector<2x128xf32>,
    return
  }
}

</mosaic_0001>

<bundles_post_ra>
// kernel: seq2seq_encoder_forward.1
= control target key start
LH: loop header
LB: loop body
LE: loop exit
PB: predicated region body
PF: predicated region fallthrough
CT: control target
= control target key end

     0   :  { %v1900_v3 = vmov 0   ;;  %v68_v60 = vlaneseq  ;;  %v1902_v63 = vmov 7   ;;  %vm135_vm6 = vcmask 523264   ;;  %s2636_s2 = inlined_call_operand.vmem [shape: bf16[64,192], index: 2, kind: input, shape index: {}]   ;;  %s2637_s3 = inlined_call_operand.vmem [shape: f32[1,192], index: 3, kind: input, shape index: {}]   ;;  %s2638_s0 = inlined_call_operand.vmem [shape: f32[8,2,192], index: 0, kind: input, shape index: {}]   ;;  %s2639_s6 = inlined_call_operand.vmem [shape: s32[2,1], index: 6, kind: input, shape index: {}]   ;;  %s2640_s4 = inlined_call_operand.vmem [shape: bf16[64,192], index: 4, kind: input, shape index: {}]   ;;  %s2641_s7 = inlined_call_operand.vmem [shape: s32[2,1], index: 7, kind: input, shape index: {}]   ;;  %s2642_s5 = inlined_call_operand.vmem [shape: f32[1,192], index: 5, kind: input, shape index: {}]   ;;  %s2643_s1 = inlined_call_operand.vmem [shape: f32[8,2,192], index: 1, kind: input, shape index: {}]   ;;  %s2644_s8 = inlined_call_operand.vmem [shape: f32[2,128], index: 8, kind: output, shape index: {}]  }
   0x1   :  { %v1657_v0 = vld [vmem:[%s2636_s2 + $0x30] sm:$0xf]  ;;  %v1778_v1 = vld [vmem:[%s2636_s2 + $0x34] sm:$0xf0]  ;;  %v1649_v2 = vld [vmem:[%s2636_s2 + $0x20] sm:$0xf]  ;;  %1797 = vset.pattern.permute.xlu0 %v1900_v3  ;;  %1798 = vset.pattern.permute.xlu2 %v1900_v3 }
   0x2   :  { %v1966_v4 = vor.u32 %v1778_v1, %v1657_v0  ;;  %v1776_v5 = vld [vmem:[%s2636_s2 + $0x24] sm:$0xf0]  ;;  %v1777_v6 = vld [vmem:[%s2636_s2 + $0x34] sm:$0xf]  ;;  %v1659_v8 = vld [vmem:[%s2636_s2 + $0x38] sm:$0xf0] }
   0x3   :  { %v1975_v7 = vor.u32 %v1776_v5, %v1649_v2  ;;  %v1775_v9 = vld [vmem:[%s2636_s2 + $0x24] sm:$0xf]  ;;  %v1651_v10 = vld [vmem:[%s2636_s2 + $0x28] sm:$0xf0]  ;;  %v1641_v11 = vld [vmem:[%s2636_s2 + $0x10] sm:$0xf]  ;;  %v1993_v13 = vor.u32 %v1777_v6, %v1659_v8 }
   0x4   :  { %143 = vmatpush.bf16.msra.mxu0 %v1966_v4  ;;  %224 = vmatpush.bf16.msra.mxu2 %v1966_v4  ;;  %v1774_v12 = vld [vmem:[%s2636_s2 + $0x14] sm:$0xf0]  ;;  %v1996_v14 = vor.u32 %v1775_v9, %v1651_v10  ;;  %v1773_v16 = vld [vmem:[%s2636_s2 + $0x14] sm:$0xf]  ;;  %v1643_v17 = vld [vmem:[%s2636_s2 + $0x18] sm:$0xf0] }
   0x5   :  { %156 = vmatpush.bf16.msra.mxu1 %v1993_v13  ;;  %237 = vmatpush.bf16.msra.mxu3 %v1993_v13  ;;  %v2000_v15 = vor.u32 %v1774_v12, %v1641_v11  ;;  %v1633_v18 = vld [vmem:[%s2636_s2] sm:$0xf]  ;;  %v1772_v19 = vld [vmem:[%s2636_s2 + $0x4] sm:$0xf0]  ;;  %v2016_v20 = vor.u32 %v1773_v16, %v1643_v17  ;;  %v1771_v22 = vld [vmem:[%s2636_s2 + $0x4] sm:$0xf] }
   0x6   :  { %v2020_v21 = vor.u32 %v1772_v19, %v1633_v18  ;;  %v1635_v23 = vld [vmem:[%s2636_s2 + $0x8] sm:$0xf0]  ;;  %v79_v25 = vld [vmem:[%s2637_s3] sm:$0x3]  ;;  %s1901_s3 = smov 64   ;;  %v2080_v61 = vand.u32 127, %v68_v60 }
   0x7   :  { %v2030_v24 = vor.u32 %v1771_v22, %v1635_v23  ;;  %v2066_v26 = vperm.slane %v79_v25, 0  ;;  %v89_v27 = vld [vmem:[%s2638_s0] sm:$0xf]  ;;  %v2072_v39 = vperm.slane %v79_v25, 1  ;;  %v1903_v1 = vmov 0.0  }
   0x8   :  { %144 = vmatpush.bf16.msra.mxu0 %v1975_v7  ;;  %225 = vmatpush.bf16.msra.mxu2 %v1975_v7  ;;  %v187_v47 = vrot.slane %v89_v27, 2  ;;  %v30_v53 = vld [vmem:[%s2639_s6] sm:$0x3]  ;;  %vm70_vm4 = vcmp.lt.s32.totalorder %v2080_v61, 32  ;;  %v1665_v9 = vld [vmem:[%s2638_s0 + $0x4] sm:$0xf] }
   0x9   :  { %157 = vmatpush.bf16.msra.mxu1 %v1996_v14  ;;  %238 = vmatpush.bf16.msra.mxu3 %v1996_v14  ;;  %v2087_v0 = vsel %vm70_vm4, 0, %v1902_v63 }
   0xc   :  { %145 = vmatpush.bf16.msra.mxu0 %v2000_v15  ;;  %226 = vmatpush.bf16.msra.mxu2 %v2000_v15 }
   0xd   :  { %158 = vmatpush.bf16.msra.mxu1 %v2016_v20  ;;  %239 = vmatpush.bf16.msra.mxu3 %v2016_v20 }
  0x10   :  { %146 = vmatpush.bf16.msra.mxu0 %v2020_v21  ;;  %227 = vmatpush.bf16.msra.mxu2 %v2020_v21 }
  0x11   :  { %159 = vmatpush.bf16.msra.mxu1 %v2030_v24  ;;  %240 = vmatpush.bf16.msra.mxu3 %v2030_v24 }
  0x13   :  { %147 = vmatmul.bf16.vlgmr.msra.gmra.mxu0 %v1900_v3 }
  0x14   :  { %315 = vmatpush.bf16.msrb.mxu0 %v1966_v4  ;;  %406 = vmatpush.bf16.msrb.mxu2 %v1966_v4 }
  0x15   :  { %328 = vmatpush.bf16.msrb.mxu1 %v1993_v13  ;;  %419 = vmatpush.bf16.msrb.mxu3 %v1993_v13 }
  0x16   :  { %160 = vmatmul.bf16.vlgmr.msra.gmra.mxu1 %v1900_v3 }
  0x18   :  { %316 = vmatpush.bf16.msrb.mxu0 %v1975_v7  ;;  %407 = vmatpush.bf16.msrb.mxu2 %v1975_v7 }
  0x19   :  { %329 = vmatpush.bf16.msrb.mxu1 %v1996_v14  ;;  %420 = vmatpush.bf16.msrb.mxu3 %v1996_v14 }
  0x1c   :  { %317 = vmatpush.bf16.msrb.mxu0 %v2000_v15  ;;  %408 = vmatpush.bf16.msrb.mxu2 %v2000_v15 }
  0x1d   :  { %330 = vmatpush.bf16.msrb.mxu1 %v2016_v20  ;;  %421 = vmatpush.bf16.msrb.mxu3 %v2016_v20 }
  0x20   :  { %318 = vmatpush.bf16.msrb.mxu0 %v2020_v21  ;;  %409 = vmatpush.bf16.msrb.mxu2 %v2020_v21 }
  0x21   :  { %331 = vmatpush.bf16.msrb.mxu1 %v2030_v24  ;;  %422 = vmatpush.bf16.msrb.mxu3 %v2030_v24 }
  0x24   :  { %497 = vmatpush.bf16.msra.mxu0 %v1966_v4 }
  0x25   :  { %510 = vmatpush.bf16.msra.mxu1 %v1993_v13 }
  0x28   :  { %498 = vmatpush.bf16.msra.mxu0 %v1975_v7 }
  0x29   :  { %511 = vmatpush.bf16.msra.mxu1 %v1996_v14 }
  0x2c   :  { %499 = vmatpush.bf16.msra.mxu0 %v2000_v15 }
  0x2d   :  { %512 = vmatpush.bf16.msra.mxu1 %v2016_v20 }
  0x30   :  { %500 = vmatpush.bf16.msra.mxu0 %v2020_v21 }
  0x31   :  { %513 = vmatpush.bf16.msra.mxu1 %v2030_v24 }
  0x90   :  { %v148_v28 = vpop.f32.mrf.mxu0 }
  0x91   :  { %v149_v29 = vadd.f32 %v148_v28, %v2066_v26 }
  0x93   :  { %v165_v30 = vadd.f32 %v149_v29, %v89_v27  ;;  %v161_v31 = vpop.f32.mrf.mxu1 }
  0x94   :  { %v162_v44 = vadd.f32 %v161_v31, %v2072_v39 }
  0x95   :  { %v1663_v32 = vmul.f32 -1.442695, %v165_v30 }
  0x97   :  { %1799 = vpow2.f32 %v1663_v32 }
  0x98   :  { %v150_v33 = vpop.f32.mrf.mxu0 }
  0x9b   :  { %v163_v34 = vpop.f32.mrf.mxu1 }
  0x9c   :  { %v268_v34 = vrot.slane %v1665_v9, 2 }
  0x9d   :  { %v1800_v35 = vpop.eup %1799 }
  0x9e   :  { %v169_v36 = vadd.f32 1.0, %v1800_v35 }
  0xa0   :  { %1801 = vrcp.f32 %v169_v36  ;;  %v181_v41 = vand.u32 2147483648, %v169_v36  ;;  %v179_v43 = vand.u32 2147483647, %v169_v36  ;;  %vm175_vm1 = vweird.f32 %v169_v36 }
  0xa2   :  { %v182_v46 = vor.u32 1.1754944e-38, %v181_v41  ;;  %vm180_vm3 = vcmp.eq.f32.partialorder %v179_v43, 8.507059e+37 }
  0xa6   :  { %v1802_v37 = vpop.eup %1801 }
  0xa7   :  { %v171_v38 = vmul.f32 %v1802_v37, %v169_v36  ;;  %vm176_vm0 = vweird.f32 %v1802_v37 }
  0xa8   :  { %vm177_vm2 = vmor %vm175_vm1, %vm176_vm0 }
  0xa9   :  { %v172_v40 = vsub.f32 1.0, %v171_v38 }
  0xab   :  { %v173_v42 = vmul.f32 %v1802_v37, %v172_v40 }
  0xad   :  { %v174_v45 = vadd.f32 %v1802_v37, %v173_v42 }
  0xaf   :  { %v178_v48 = vsel %vm177_vm2, %v1802_v37, %v174_v45 }
  0xb0   :  { %v183_v49 = vsel %vm180_vm3, %v182_v46, %v178_v48 }
  0xb1   :  { %v185_v50 = vmul.f32 %v183_v49, %v162_v44  ;;  %v191_v54 = vsub.f32 1.0, %v183_v49  ;;  %v197_v56 = vmul.f32 0.0, %v183_v49 }
  0xb3   :  { %v189_v51 = vadd.f32 %v187_v47, %v185_v50  ;;  %v1904_v50 = vmov 6  }
  0xb5   :  { %1803 = vtanh.f32 %v189_v51  ;;  %v2117_v51 = vsel %vm70_vm4, 1, %v1904_v50  ;;  %v1675_v50 = vld [vmem:[%s2638_s0 + $0xc] sm:$0xf] }
  0xbb   :  { %v1804_v52 = vpop.eup %1803 }
  0xbc   :  { %193 = vrot.lane.b32.xlu0 %v1804_v52, %s1901_s3 }
  0xc4   :  { %201 = vperm.xlu0 %1797, %v30_v53  }
 0x12e   :  { %v194_v55 = vpop.permute.xlu0 %193 }
 0x12f   :  { %v196_v57 = vmul.f32 %v194_v55, %v191_v54 }
 0x131   :  { %v198_v58 = vadd.f32 %v197_v56, %v196_v57  ;;  %v1670_v57 = vld [vmem:[%s2638_s0 + $0x8] sm:$0xf] }
 0x133   :  { %207 = vst [vmem:[#allocation1] ss:$4 sm:$0xff] %v198_v58 }
 0x136   :  { %v2083_v62 = vpop.permute.xlu0 %201 }
 0x137   :  { %vm203_vm5 = vcmp.lt.s32.totalorder %v2087_v0, %v2083_v62  ;;  %vm285_vm11 = vcmp.lt.s32.totalorder %v2117_v51, %v2083_v62 }
 0x138   :  { %v1664_v2 = vsel %vm203_vm5, 1.0, %v1903_v1  ;;  %v2122_v52 = vsel %vm285_vm11, 1.0, %v1903_v1 }
 0x13a   :  { %v208_v59 = vld.sshfl [vmem:[#allocation1] sm:$0xff pattern:$0x73625140] }
 0x13b   :  { %209 = vrot.lane.b32.xlu1 %v208_v59, %s1901_s3 }
 0x1ad   :  { %v210_v5 = vpop.permute.xlu1 %209 }
 0x1ae   :  { %v2092_v6 = vmul.f32 %v1664_v2, %v210_v5 }
 0x1b0   :  { %279 = vrot.lane.b32.xlu2 %v2092_v6, %s1901_s3  ;;  %v216_v8 = vpack.c.bf16 %v2092_v6, %v2092_v6 }
 0x1b2   :  { %1666 = vmatmul.msk.bf16.vlgmr.msra.gmra.mxu2 %vm135_vm6, %v216_v8  ;;  %1667 = vmatmul.msk.bf16.vlgmr.msra.gmra.mxu3 %vm135_vm6, %v216_v8 }
 0x1b3   :  { %588 = vmatpush.bf16.msra.mxu2 %v1966_v4  ;;  %601 = vmatpush.bf16.msra.mxu3 %v1993_v13 }
 0x1b7   :  { %589 = vmatpush.bf16.msra.mxu2 %v1975_v7  ;;  %602 = vmatpush.bf16.msra.mxu3 %v1996_v14 }
 0x1bb   :  { %590 = vmatpush.bf16.msra.mxu2 %v2000_v15  ;;  %603 = vmatpush.bf16.msra.mxu3 %v2016_v20 }
 0x1bf   :  { %591 = vmatpush.bf16.msra.mxu2 %v2020_v21  ;;  %604 = vmatpush.bf16.msra.mxu3 %v2030_v24 }
 0x20a   :  { %v280_v43 = vpop.permute.xlu2 %279 }
 0x235   :  { %v229_v10 = vpop.f32.mrf.mxu2  ;;  %v242_v11 = vpop.f32.mrf.mxu3 }
 0x236   :  { %v230_v12 = vadd.f32 %v229_v10, %v2066_v26  ;;  %v243_v35 = vadd.f32 %v242_v11, %v2072_v39 }
 0x238   :  { %v246_v16 = vadd.f32 %v1665_v9, %v230_v12 }
 0x23a   :  { %v1668_v17 = vmul.f32 -1.442695, %v246_v16 }
 0x23c   :  { %1805 = vpow2.f32 %v1668_v17 }
 0x23d   :  { %v231_v18 = vpop.f32.mrf.mxu2  ;;  %v244_v19 = vpop.f32.mrf.mxu3 }
 0x242   :  { %v1806_v22 = vpop.eup %1805 }
 0x243   :  { %v250_v23 = vadd.f32 1.0, %v1806_v22 }
 0x245   :  { %1807 = vrcp.f32 %v250_v23  ;;  %v262_v29 = vand.u32 2147483648, %v250_v23  ;;  %v260_v31 = vand.u32 2147483647, %v250_v23  ;;  %vm256_vm8 = vweird.f32 %v250_v23 }
 0x247   :  { %v263_v33 = vor.u32 1.1754944e-38, %v262_v29  ;;  %vm261_vm10 = vcmp.eq.f32.partialorder %v260_v31, 8.507059e+37 }
 0x24b   :  { %v1808_v25 = vpop.eup %1807 }
 0x24c   :  { %v252_v27 = vmul.f32 %v1808_v25, %v250_v23  ;;  %vm257_vm7 = vweird.f32 %v1808_v25 }
 0x24d   :  { %vm258_vm9 = vmor %vm256_vm8, %vm257_vm7 }
 0x24e   :  { %v253_v28 = vsub.f32 1.0, %v252_v27 }
 0x250   :  { %v254_v30 = vmul.f32 %v1808_v25, %v253_v28 }
 0x252   :  { %v255_v32 = vadd.f32 %v1808_v25, %v254_v30 }
 0x254   :  { %v259_v36 = vsel %vm258_vm9, %v1808_v25, %v255_v32  ;;  %v359_v25 = vrot.slane %v1670_v57, 2 }
 0x255   :  { %v264_v37 = vsel %vm261_vm10, %v263_v33, %v259_v36 }
 0x256   :  { %v266_v38 = vmul.f32 %v264_v37, %v243_v35  ;;  %v272_v42 = vsub.f32 1.0, %v264_v37  ;;  %v282_v45 = vmul.f32 %v280_v43, %v264_v37 }
 0x258   :  { %v270_v40 = vadd.f32 %v268_v34, %v266_v38 }
 0x25a   :  { %1809 = vtanh.f32 %v270_v40 }
 0x260   :  { %v1810_v41 = vpop.eup %1809 }
 0x261   :  { %274 = vrot.lane.b32.xlu1 %v1810_v41, %s1901_s3 }
 0x2d3   :  { %v275_v44 = vpop.permute.xlu1 %274 }
 0x2d4   :  { %v277_v46 = vmul.f32 %v275_v44, %v272_v42 }
 0x2d6   :  { %v283_v47 = vadd.f32 %v282_v45, %v277_v46 }
 0x2d8   :  { %v288_v48 = vsub.f32 %v283_v47, %v280_v43  ;;  %v1905_v43 = vmov 5  }
 0x2d9   :  { %v2153_v44 = vsel %vm70_vm4, 2, %v1905_v43 }
 0x2da   :  { %290 = vst [vmem:[#allocation1] ss:$4 sm:$0xff] %v288_v48  ;;  %vm376_vm0 = vcmp.lt.s32.totalorder %v2153_v44, %v2083_v62 }
 0x2db   :  { %v2158_v45 = vsel %vm376_vm0, 1.0, %v1903_v1 }
 0x2e1   :  { %v291_v49 = vld.sshfl [vmem:[#allocation1] sm:$0xff pattern:$0x73625140] }
 0x2e2   :  { %298 = vst [vmem:[#allocation1] ss:$4 sm:$0xff] %v283_v47  ;;  %292 = vrot.lane.b32.xlu2 %v291_v49, %s1901_s3 }
 0x2e9   :  { %v2148_v41 = vld.sshfl [vmem:[#allocation1] sm:$0xff pattern:$0x73625140] }
 0x33c   :  { %v293_v53 = vpop.permute.xlu2 %292 }
 0x33d   :  { %v295_v54 = vmul.f32 %v2122_v52, %v293_v53 }
 0x33f   :  { %v2126_v55 = vadd.f32 %v295_v54, %v2092_v6 }
 0x341   :  { %v307_v56 = vpack.c.bf16 %v2126_v55, %v2126_v55  ;;  %370 = vrot.lane.b32.xlu2 %v2126_v55, %s1901_s3 }
 0x343   :  { %1671 = vmatmul.msk.bf16.vlgmr.msrb.gmra.mxu0 %vm135_vm6, %v307_v56  ;;  %1672 = vmatmul.msk.bf16.vlgmr.msrb.gmra.mxu1 %vm135_vm6, %v307_v56 }
 0x344   :  { %679 = vmatpush.bf16.msrb.mxu0 %v1966_v4  ;;  %692 = vmatpush.bf16.msrb.mxu1 %v1993_v13 }
 0x348   :  { %680 = vmatpush.bf16.msrb.mxu0 %v1975_v7  ;;  %693 = vmatpush.bf16.msrb.mxu1 %v1996_v14 }
 0x34c   :  { %681 = vmatpush.bf16.msrb.mxu0 %v2000_v15  ;;  %694 = vmatpush.bf16.msrb.mxu1 %v2016_v20 }
 0x350   :  { %682 = vmatpush.bf16.msrb.mxu0 %v2020_v21  ;;  %695 = vmatpush.bf16.msrb.mxu1 %v2030_v24 }
 0x39b   :  { %v371_v34 = vpop.permute.xlu2 %370 }
 0x3c0   :  { %v320_v58 = vpop.f32.mrf.mxu0  ;;  %v333_v59 = vpop.f32.mrf.mxu1 }
 0x3c1   :  { %v321_v60 = vadd.f32 %v320_v58, %v2066_v26  ;;  %v334_v27 = vadd.f32 %v333_v59, %v2072_v39 }
 0x3c3   :  { %v337_v63 = vadd.f32 %v1670_v57, %v321_v60 }
 0x3c5   :  { %v1673_v2 = vmul.f32 -1.442695, %v337_v63 }
 0x3c7   :  { %1811 = vpow2.f32 %v1673_v2  ;;  %v450_v2 = vrot.slane %v1675_v50, 2 }
 0x3c8   :  { %v322_v5 = vpop.f32.mrf.mxu0  ;;  %v335_v8 = vpop.f32.mrf.mxu1 }
 0x3cd   :  { %v1812_v9 = vpop.eup %1811 }
 0x3ce   :  { %v341_v10 = vadd.f32 1.0, %v1812_v9 }
 0x3d0   :  { %1813 = vrcp.f32 %v341_v10  ;;  %v353_v17 = vand.u32 2147483648, %v341_v10  ;;  %v351_v19 = vand.u32 2147483647, %v341_v10  ;;  %vm347_vm13 = vweird.f32 %v341_v10 }
 0x3d2   :  { %v354_v23 = vor.u32 1.1754944e-38, %v353_v17  ;;  %vm352_vm15 = vcmp.eq.f32.partialorder %v351_v19, 8.507059e+37 }
 0x3d6   :  { %v1814_v11 = vpop.eup %1813 }
 0x3d7   :  { %v343_v12 = vmul.f32 %v1814_v11, %v341_v10  ;;  %vm348_vm12 = vweird.f32 %v1814_v11 }
 0x3d8   :  { %vm349_vm14 = vmor %vm347_vm13, %vm348_vm12 }
 0x3d9   :  { %v344_v16 = vsub.f32 1.0, %v343_v12 }
 0x3db   :  { %v345_v18 = vmul.f32 %v1814_v11, %v344_v16 }
 0x3dd   :  { %v346_v22 = vadd.f32 %v1814_v11, %v345_v18 }
 0x3df   :  { %v350_v28 = vsel %vm349_vm14, %v1814_v11, %v346_v22 }
 0x3e0   :  { %v355_v29 = vsel %vm352_vm15, %v354_v23, %v350_v28 }
 0x3e1   :  { %v357_v30 = vmul.f32 %v355_v29, %v334_v27  ;;  %v363_v33 = vsub.f32 1.0, %v355_v29  ;;  %v373_v36 = vmul.f32 %v371_v34, %v355_v29  ;;  %v1906_v29 = vmov 4  }
 0x3e3   :  { %v361_v31 = vadd.f32 %v359_v25, %v357_v30  ;;  %v2189_v30 = vsel %vm70_vm4, 3, %v1906_v29 }
 0x3e4   :  { %vm467_vm7 = vcmp.lt.s32.totalorder %v2189_v30, %v2083_v62 }
 0x3e5   :  { %1815 = vtanh.f32 %v361_v31  ;;  %v2194_v31 = vsel %vm467_vm7, 1.0, %v1903_v1 }
 0x3eb   :  { %v1816_v32 = vpop.eup %1815 }
 0x3ec   :  { %365 = vrot.lane.b32.xlu1 %v1816_v32, %s1901_s3 }
 0x45e   :  { %v366_v35 = vpop.permute.xlu1 %365 }
 0x45f   :  { %v368_v37 = vmul.f32 %v366_v35, %v363_v33 }
 0x461   :  { %v374_v38 = vadd.f32 %v373_v36, %v368_v37  ;;  %v1680_v36 = vld [vmem:[%s2638_s0 + $0x10] sm:$0xf] }
 0x463   :  { %v379_v40 = vsub.f32 %v374_v38, %v371_v34 }
 0x465   :  { %381 = vst [vmem:[#allocation1] ss:$4 sm:$0xff] %v379_v40 }
 0x46c   :  { %v382_v42 = vld.sshfl [vmem:[#allocation1] sm:$0xff pattern:$0x73625140] }
 0x46d   :  { %389 = vst [vmem:[#allocation1] ss:$4 sm:$0xff] %v374_v38  ;;  %383 = vrot.lane.b32.xlu0 %v382_v42, %s1901_s3 }
 0x474   :  { %v2184_v27 = vld.sshfl [vmem:[#allocation1] sm:$0xff pattern:$0x73625140] }
 0x4df   :  { %v384_v46 = vpop.permute.xlu0 %383 }
 0x4e0   :  { %v386_v47 = vmul.f32 %v2158_v45, %v384_v46 }
 0x4e2   :  { %v2162_v48 = vadd.f32 %v386_v47, %v2126_v55 }
 0x4e4   :  { %v398_v49 = vpack.c.bf16 %v2162_v48, %v2162_v48  ;;  %461 = vrot.lane.b32.xlu2 %v2162_v48, %s1901_s3 }
 0x4e6   :  { %1676 = vmatmul.msk.bf16.vlgmr.msrb.gmra.mxu2 %vm135_vm6, %v398_v49  ;;  %1677 = vmatmul.msk.bf16.vlgmr.msrb.gmra.mxu3 %vm135_vm6, %v398_v49 }
 0x4e7   :  { %770 = vmatpush.bf16.msrb.mxu2 %v1966_v4  ;;  %783 = vmatpush.bf16.msrb.mxu3 %v1993_v13 }
 0x4eb   :  { %771 = vmatpush.bf16.msrb.mxu2 %v1975_v7  ;;  %784 = vmatpush.bf16.msrb.mxu3 %v1996_v14 }
 0x4ef   :  { %772 = vmatpush.bf16.msrb.mxu2 %v2000_v15  ;;  %785 = vmatpush.bf16.msrb.mxu3 %v2016_v20 }
 0x4f3   :  { %773 = vmatpush.bf16.msrb.mxu2 %v2020_v21  ;;  %786 = vmatpush.bf16.msrb.mxu3 %v2030_v24 }
 0x53e   :  { %v462_v17 = vpop.permute.xlu2 %461 }
 0x569   :  { %v411_v53 = vpop.f32.mrf.mxu2  ;;  %v424_v4 = vpop.f32.mrf.mxu3 }
 0x56a   :  { %v412_v13 = vadd.f32 %v411_v53, %v2066_v26  ;;  %v425_v5 = vadd.f32 %v424_v4, %v2072_v39 }
 0x56c   :  { %v428_v54 = vadd.f32 %v1675_v50, %v412_v13 }
 0x56e   :  { %v1678_v7 = vmul.f32 -1.442695, %v428_v54 }
 0x570   :  { %1817 = vpow2.f32 %v1678_v7 }
 0x571   :  { %v413_v14 = vpop.f32.mrf.mxu2  ;;  %v426_v55 = vpop.f32.mrf.mxu3 }
 0x576   :  { %v1818_v15 = vpop.eup %1817 }
 0x577   :  { %v432_v56 = vadd.f32 1.0, %v1818_v15  ;;  %v541_v15 = vrot.slane %v1680_v36, 2 }
 0x579   :  { %1819 = vrcp.f32 %v432_v56  ;;  %v444_v24 = vand.u32 2147483648, %v432_v56  ;;  %v442_v59 = vand.u32 2147483647, %v432_v56  ;;  %vm438_vm2 = vweird.f32 %v432_v56 }
 0x57b   :  { %v445_v63 = vor.u32 1.1754944e-38, %v444_v24  ;;  %vm443_vm5 = vcmp.eq.f32.partialorder %v442_v59, 8.507059e+37 }
 0x57f   :  { %v1820_v20 = vpop.eup %1819 }
 0x580   :  { %v434_v21 = vmul.f32 %v1820_v20, %v432_v56  ;;  %vm439_vm1 = vweird.f32 %v1820_v20 }
 0x581   :  { %vm440_vm3 = vmor %vm438_vm2, %vm439_vm1 }
 0x582   :  { %v435_v57 = vsub.f32 1.0, %v434_v21 }
 0x584   :  { %v436_v58 = vmul.f32 %v1820_v20, %v435_v57 }
 0x586   :  { %v437_v60 = vadd.f32 %v1820_v20, %v436_v58 }
 0x588   :  { %v441_v8 = vsel %vm440_vm3, %v1820_v20, %v437_v60 }
 0x589   :  { %v446_v9 = vsel %vm443_vm5, %v445_v63, %v441_v8 }
 0x58a   :  { %v448_v10 = vmul.f32 %v446_v9, %v425_v5  ;;  %v454_v16 = vsub.f32 1.0, %v446_v9  ;;  %v464_v19 = vmul.f32 %v462_v17, %v446_v9 }
 0x58c   :  { %v452_v11 = vadd.f32 %v450_v2, %v448_v10 }
 0x58e   :  { %1821 = vtanh.f32 %v452_v11 }
 0x594   :  { %v1822_v12 = vpop.eup %1821 }
 0x595   :  { %456 = vrot.lane.b32.xlu1 %v1822_v12, %s1901_s3  ;;  %v1907_v12 = vmov 3  }
 0x607   :  { %v457_v18 = vpop.permute.xlu1 %456 }
 0x608   :  { %v459_v22 = vmul.f32 %v457_v18, %v454_v16  ;;  %v2212_v16 = vsel %vm70_vm4, 4, %v1907_v12 }
 0x609   :  { %vm558_vm12 = vcmp.lt.s32.totalorder %v2212_v16, %v2083_v62 }
 0x60a   :  { %v465_v23 = vadd.f32 %v464_v19, %v459_v22 }
 0x60c   :  { %v470_v25 = vsub.f32 %v465_v23, %v462_v17  ;;  %v2217_v17 = vsel %vm558_vm12, 1.0, %v1903_v1 }
 0x60e   :  { %472 = vst [vmem:[#allocation1] ss:$4 sm:$0xff] %v470_v25  ;;  %v1685_v25 = vld [vmem:[%s2638_s0 + $0x14] sm:$0xf] }
 0x615   :  { %v473_v28 = vld.sshfl [vmem:[#allocation1] sm:$0xff pattern:$0x73625140] }
 0x616   :  { %480 = vst [vmem:[#allocation1] ss:$4 sm:$0xff] %v465_v23  ;;  %474 = vrot.lane.b32.xlu0 %v473_v28, %s1901_s3 }
 0x61d   :  { %v2207_v10 = vld.sshfl [vmem:[#allocation1] sm:$0xff pattern:$0x73625140] }
 0x688   :  { %v475_v32 = vpop.permute.xlu0 %474 }
 0x689   :  { %v477_v33 = vmul.f32 %v2194_v31, %v475_v32 }
 0x68b   :  { %v478_v34 = vadd.f32 %v477_v33, %v2162_v48 }
 0x68d   :  { %v489_v35 = vpack.c.bf16 %v478_v34, %v478_v34  ;;  %552 = vrot.lane.b32.xlu2 %v478_v34, %s1901_s3 }
 0x68f   :  { %1681 = vmatmul.msk.bf16.vlgmr.msra.gmra.mxu0 %vm135_vm6, %v489_v35  ;;  %1682 = vmatmul.msk.bf16.vlgmr.msra.gmra.mxu1 %vm135_vm6, %v489_v35 }
 0x6e7   :  { %v553_v60 = vpop.permute.xlu2 %552 }
 0x70c   :  { %v502_v37 = vpop.f32.mrf.mxu0  ;;  %v515_v38 = vpop.f32.mrf.mxu1 }
 0x70d   :  { %v503_v40 = vadd.f32 %v502_v37, %v2066_v26  ;;  %v516_v56 = vadd.f32 %v515_v38, %v2072_v39 }
 0x70f   :  { %v519_v42 = vadd.f32 %v1680_v36, %v503_v40 }
 0x711   :  { %v1683_v43 = vmul.f32 -1.442695, %v519_v42 }
 0x713   :  { %1823 = vpow2.f32 %v1683_v43 }
 0x714   :  { %v504_v46 = vpop.f32.mrf.mxu0  ;;  %v517_v47 = vpop.f32.mrf.mxu1 }
 0x719   :  { %v1824_v48 = vpop.eup %1823 }
 0x71a   :  { %v523_v49 = vadd.f32 1.0, %v1824_v48 }
 0x71c   :  { %1825 = vrcp.f32 %v523_v49  ;;  %v535_v13 = vand.u32 2147483648, %v523_v49  ;;  %v533_v7 = vand.u32 2147483647, %v523_v49  ;;  %vm529_vm9 = vweird.f32 %v523_v49 }
 0x71e   :  { %v536_v55 = vor.u32 1.1754944e-38, %v535_v13  ;;  %vm534_vm11 = vcmp.eq.f32.partialorder %v533_v7, 8.507059e+37 }
 0x722   :  { %v1826_v50 = vpop.eup %1825 }
 0x723   :  { %v525_v53 = vmul.f32 %v1826_v50, %v523_v49  ;;  %vm530_vm8 = vweird.f32 %v1826_v50 }
 0x724   :  { %vm531_vm10 = vmor %vm529_vm9, %vm530_vm8 }
 0x725   :  { %v526_v4 = vsub.f32 1.0, %v525_v53  ;;  %v632_v53 = vrot.slane %v1685_v25, 2 }
 0x727   :  { %v527_v54 = vmul.f32 %v1826_v50, %v526_v4 }
 0x729   :  { %v528_v14 = vadd.f32 %v1826_v50, %v527_v54 }
 0x72b   :  { %v532_v20 = vsel %vm531_vm10, %v1826_v50, %v528_v14 }
 0x72c   :  { %v537_v21 = vsel %vm534_vm11, %v536_v55, %v532_v20 }
 0x72d   :  { %v539_v57 = vmul.f32 %v537_v21, %v516_v56  ;;  %v545_v59 = vsub.f32 1.0, %v537_v21  ;;  %v555_v2 = vmul.f32 %v553_v60, %v537_v21 }
 0x72f   :  { %v543_v24 = vadd.f32 %v541_v15, %v539_v57 }
 0x731   :  { %1827 = vtanh.f32 %v543_v24 }
 0x737   :  { %v1828_v58 = vpop.eup %1827 }
 0x738   :  { %547 = vrot.lane.b32.xlu1 %v1828_v58, %s1901_s3 }
 0x7aa   :  { %v548_v63 = vpop.permute.xlu1 %547 }
 0x7ab   :  { %v550_v5 = vmul.f32 %v548_v63, %v545_v59  ;;  %v1908_v63 = vmov 2  }
 0x7ad   :  { %v556_v8 = vadd.f32 %v555_v2, %v550_v5  ;;  %v2234_v2 = vsel %vm70_vm4, 5, %v1908_v63 }
 0x7ae   :  { %vm649_vm1 = vcmp.lt.s32.totalorder %v2234_v2, %v2083_v62 }
 0x7af   :  { %v561_v9 = vsub.f32 %v556_v8, %v553_v60  ;;  %v2239_v5 = vsel %vm649_vm1, 1.0, %v1903_v1 }
 0x7b1   :  { %563 = vst [vmem:[#allocation1] ss:$4 sm:$0xff] %v561_v9 }
 0x7b8   :  { %v564_v11 = vld.sshfl [vmem:[#allocation1] sm:$0xff pattern:$0x73625140] }
 0x7b9   :  { %571 = vst [vmem:[#allocation1] ss:$4 sm:$0xff] %v556_v8  ;;  %565 = vrot.lane.b32.xlu0 %v564_v11, %s1901_s3 }
 0x7c0   :  { %v2229_v59 = vld.sshfl [vmem:[#allocation1] sm:$0xff pattern:$0x73625140] }
 0x82b   :  { %v566_v18 = vpop.permute.xlu0 %565 }
 0x82c   :  { %v568_v19 = vmul.f32 %v2217_v17, %v566_v18  ;;  %v1690_v18 = vld [vmem:[%s2638_s0 + $0x18] sm:$0xf] }
 0x82e   :  { %v569_v22 = vadd.f32 %v568_v19, %v478_v34 }
 0x830   :  { %v580_v23 = vpack.c.bf16 %v569_v22, %v569_v22  ;;  %643 = vrot.lane.b32.xlu2 %v569_v22, %s1901_s3 }
 0x832   :  { %1686 = vmatmul.msk.bf16.vlgmr.msra.gmra.mxu2 %vm135_vm6, %v580_v23  ;;  %1687 = vmatmul.msk.bf16.vlgmr.msra.gmra.mxu3 %vm135_vm6, %v580_v23 }
 0x88a   :  { %v644_v56 = vpop.permute.xlu2 %643 }
 0x8b5   :  { %v593_v28 = vpop.f32.mrf.mxu2  ;;  %v606_v29 = vpop.f32.mrf.mxu3 }
 0x8b6   :  { %v594_v32 = vadd.f32 %v593_v28, %v2066_v26  ;;  %v607_v4 = vadd.f32 %v606_v29, %v2072_v39 }
 0x8b8   :  { %v610_v33 = vadd.f32 %v1685_v25, %v594_v32 }
 0x8ba   :  { %v1688_v35 = vmul.f32 -1.442695, %v610_v33 }
 0x8bc   :  { %1829 = vpow2.f32 %v1688_v35 }
 0x8bd   :  { %v595_v36 = vpop.f32.mrf.mxu2  ;;  %v608_v34 = vpop.f32.mrf.mxu3 }
 0x8c2   :  { %v1830_v37 = vpop.eup %1829 }
 0x8c3   :  { %v614_v38 = vadd.f32 1.0, %v1830_v37 }
 0x8c5   :  { %1831 = vrcp.f32 %v614_v38  ;;  %v626_v46 = vand.u32 2147483648, %v614_v38  ;;  %v624_v48 = vand.u32 2147483647, %v614_v38  ;;  %vm620_vm14 = vweird.f32 %v614_v38 }
 0x8c7   :  { %v627_v50 = vor.u32 1.1754944e-38, %v626_v46  ;;  %vm625_vm0 = vcmp.eq.f32.partialorder %v624_v48, 8.507059e+37 }
 0x8cb   :  { %v1832_v40 = vpop.eup %1831 }
 0x8cc   :  { %v616_v42 = vmul.f32 %v1832_v40, %v614_v38  ;;  %vm621_vm13 = vweird.f32 %v1832_v40 }
 0x8cd   :  { %vm622_vm15 = vmor %vm620_vm14, %vm621_vm13 }
 0x8ce   :  { %v617_v43 = vsub.f32 1.0, %v616_v42 }
 0x8d0   :  { %v618_v47 = vmul.f32 %v1832_v40, %v617_v43 }
 0x8d2   :  { %v619_v49 = vadd.f32 %v1832_v40, %v618_v47  ;;  %v723_v47 = vrot.slane %v1690_v18, 2 }
 0x8d4   :  { %v623_v13 = vsel %vm622_vm15, %v1832_v40, %v619_v49 }
 0x8d5   :  { %v628_v54 = vsel %vm625_vm0, %v627_v50, %v623_v13 }
 0x8d6   :  { %v630_v7 = vmul.f32 %v628_v54, %v607_v4  ;;  %v636_v15 = vsub.f32 1.0, %v628_v54  ;;  %v646_v21 = vmul.f32 %v644_v56, %v628_v54 }
 0x8d8   :  { %v634_v14 = vadd.f32 %v632_v53, %v630_v7 }
 0x8da   :  { %1833 = vtanh.f32 %v634_v14 }
 0x8e0   :  { %v1834_v55 = vpop.eup %1833 }
 0x8e1   :  { %638 = vrot.lane.b32.xlu1 %v1834_v55, %s1901_s3 }
 0x953   :  { %v639_v20 = vpop.permute.xlu1 %638 }
 0x954   :  { %v641_v57 = vmul.f32 %v639_v20, %v636_v15 }
 0x956   :  { %v647_v24 = vadd.f32 %v646_v21, %v641_v57 }
 0x958   :  { %v652_v58 = vsub.f32 %v647_v24, %v644_v56 }
 0x95a   :  { %654 = vst [vmem:[#allocation1] ss:$4 sm:$0xff] %v652_v58 }
 0x961   :  { %v655_v60 = vld.sshfl [vmem:[#allocation1] sm:$0xff pattern:$0x73625140] }
 0x962   :  { %662 = vst [vmem:[#allocation1] ss:$4 sm:$0xff] %v647_v24  ;;  %656 = vrot.lane.b32.xlu0 %v655_v60, %s1901_s3  ;;  %v1909_v24 = vmov 1  }
 0x963   :  { %v2256_v58 = vsel %vm70_vm4, 6, %v1909_v24 }
 0x964   :  { %vm740_vm8 = vcmp.lt.s32.totalorder %v2256_v58, %v2083_v62 }
 0x965   :  { %v2261_v60 = vsel %vm740_vm8, 1.0, %v1903_v1 }
 0x969   :  { %v2251_v21 = vld.sshfl [vmem:[#allocation1] sm:$0xff pattern:$0x73625140] }
 0x9d4   :  { %v657_v8 = vpop.permute.xlu0 %656 }
 0x9d5   :  { %v659_v9 = vmul.f32 %v2239_v5, %v657_v8 }
 0x9d7   :  { %v660_v11 = vadd.f32 %v659_v9, %v569_v22 }
 0x9d9   :  { %v671_v12 = vpack.c.bf16 %v660_v11, %v660_v11  ;;  %734 = vrot.lane.b32.xlu2 %v660_v11, %s1901_s3 }
 0x9db   :  { %1691 = vmatmul.msk.bf16.vlgmr.msrb.gmra.mxu0 %vm135_vm6, %v671_v12  ;;  %1692 = vmatmul.msk.bf16.vlgmr.msrb.gmra.mxu1 %vm135_vm6, %v671_v12 }
 0xa33   :  { %v735_v7 = vpop.permute.xlu2 %734 }
 0xa58   :  { %v684_v19 = vpop.f32.mrf.mxu0  ;;  %v697_v23 = vpop.f32.mrf.mxu1 }
 0xa59   :  { %v685_v25 = vadd.f32 %v684_v19, %v2066_v26  ;;  %v698_v48 = vadd.f32 %v697_v23, %v2072_v39 }
 0xa5b   :  { %v701_v28 = vadd.f32 %v1690_v18, %v685_v25  ;;  %v1695_v18 = vld [vmem:[%s2638_s0 + $0x1c] sm:$0xf] }
 0xa5d   :  { %v1693_v29 = vmul.f32 -1.442695, %v701_v28 }
 0xa5f   :  { %1835 = vpow2.f32 %v1693_v29 }
 0xa60   :  { %v686_v32 = vpop.f32.mrf.mxu0  ;;  %v699_v22 = vpop.f32.mrf.mxu1 }
 0xa65   :  { %v1836_v33 = vpop.eup %1835 }
 0xa66   :  { %v705_v35 = vadd.f32 1.0, %v1836_v33 }
 0xa68   :  { %1837 = vrcp.f32 %v705_v35  ;;  %v717_v38 = vand.u32 2147483648, %v705_v35  ;;  %v715_v42 = vand.u32 2147483647, %v705_v35  ;;  %vm711_vm3 = vweird.f32 %v705_v35 }
 0xa6a   :  { %v718_v46 = vor.u32 1.1754944e-38, %v717_v38  ;;  %vm716_vm7 = vcmp.eq.f32.partialorder %v715_v42, 8.507059e+37 }
 0xa6e   :  { %v1838_v36 = vpop.eup %1837 }
 0xa6f   :  { %v707_v34 = vmul.f32 %v1838_v36, %v705_v35  ;;  %vm712_vm2 = vweird.f32 %v1838_v36 }
 0xa70   :  { %vm713_vm5 = vmor %vm711_vm3, %vm712_vm2 }
 0xa71   :  { %v708_v37 = vsub.f32 1.0, %v707_v34 }
 0xa73   :  { %v709_v40 = vmul.f32 %v1838_v36, %v708_v37 }
 0xa75   :  { %v710_v43 = vadd.f32 %v1838_v36, %v709_v40 }
 0xa77   :  { %v714_v49 = vsel %vm713_vm5, %v1838_v36, %v710_v43 }
 0xa78   :  { %v719_v50 = vsel %vm716_vm7, %v718_v46, %v714_v49 }
 0xa79   :  { %v721_v53 = vmul.f32 %v719_v50, %v698_v48  ;;  %v727_v54 = vsub.f32 1.0, %v719_v50  ;;  %v737_v55 = vmul.f32 %v735_v7, %v719_v50 }
 0xa7b   :  { %v725_v4 = vadd.f32 %v723_v47, %v721_v53 }
 0xa7d   :  { %1839 = vtanh.f32 %v725_v4  ;;  %v1726_v4 = vld [vmem:[%s2640_s4 + $0x30] sm:$0xf] }
 0xa83   :  { %v1840_v13 = vpop.eup %1839 }
 0xa84   :  { %729 = vrot.lane.b32.xlu1 %v1840_v13, %s1901_s3  ;;  %v1786_v13 = vld [vmem:[%s2640_s4 + $0x34] sm:$0xf0] }
 0xaf6   :  { %v730_v14 = vpop.permute.xlu1 %729 }
 0xaf7   :  { %v732_v15 = vmul.f32 %v730_v14, %v727_v54  ;;  %v2287_v54 = vor.u32 %v1786_v13, %v1726_v4  ;;  %v1718_v14 = vld [vmem:[%s2640_s4 + $0x20] sm:$0xf] }
 0xaf9   :  { %v738_v56 = vadd.f32 %v737_v55, %v732_v15  ;;  %v1784_v55 = vld [vmem:[%s2640_s4 + $0x24] sm:$0xf0]  ;;  %905 = vmatpush.bf16.msra.mxu0 %v2287_v54  ;;  %998 = vmatpush.bf16.msra.mxu2 %v2287_v54 }
 0xafb   :  { %v743_v20 = vsub.f32 %v738_v56, %v735_v7  ;;  %v1728_v7 = vld [vmem:[%s2640_s4 + $0x38] sm:$0xf0] }
 0xafd   :  { %745 = vst [vmem:[#allocation1] ss:$4 sm:$0xff] %v743_v20  ;;  %v1720_v20 = vld [vmem:[%s2640_s4 + $0x28] sm:$0xf0] }
 0xb04   :  { %v746_v57 = vld.sshfl [vmem:[#allocation1] sm:$0xff pattern:$0x73625140] }
 0xb05   :  { %747 = vrot.lane.b32.xlu0 %v746_v57, %s1901_s3  ;;  %753 = vst [vmem:[#allocation1] ss:$4 sm:$0xff] %v738_v56  ;;  %v1783_v56 = vld [vmem:[%s2640_s4 + $0x24] sm:$0xf]  ;;  %v2307_v57 = vor.u32 %v1784_v55, %v1718_v14 }
 0xb06   :  { %v2311_v24 = vor.u32 %v1783_v56, %v1720_v20 }
 0xb07   :  { %906 = vmatpush.bf16.msra.mxu0 %v2307_v57  ;;  %999 = vmatpush.bf16.msra.mxu2 %v2307_v57 }
 0xb77   :  { %v748_v63 = vpop.permute.xlu0 %747 }
 0xb78   :  { %v750_v8 = vmul.f32 %v2261_v60, %v748_v63  ;;  %v1710_v63 = vld [vmem:[%s2640_s4 + $0x10] sm:$0xf] }
 0xb7a   :  { %v2264_v9 = vadd.f32 %v750_v8, %v660_v11  ;;  %v1782_v8 = vld [vmem:[%s2640_s4 + $0x14] sm:$0xf0] }
 0xb7c   :  { %v762_v12 = vpack.c.bf16 %v2264_v9, %v2264_v9  ;;  %825 = vrot.lane.b32.xlu2 %v2264_v9, %s1901_s3 }
 0xb7e   :  { %1696 = vmatmul.msk.bf16.vlgmr.msrb.gmra.mxu2 %vm135_vm6, %v762_v12  ;;  %1697 = vmatmul.msk.bf16.vlgmr.msrb.gmra.mxu3 %vm135_vm6, %v762_v12  ;;  %v1781_v12 = vld [vmem:[%s2640_s4 + $0x14] sm:$0xf] }
 0xc01   :  { %v775_v19 = vpop.f32.mrf.mxu2  ;;  %v788_v23 = vpop.f32.mrf.mxu3 }
 0xc02   :  { %v776_v25 = vadd.f32 %v775_v19, %v2066_v26  ;;  %v814_v26 = vrot.slane %v1695_v18, 2  ;;  %v789_v46 = vadd.f32 %v788_v23, %v2072_v39  ;;  %v1785_v39 = vld [vmem:[%s2640_s4 + $0x34] sm:$0xf]  ;;  %v2327_v19 = vor.u32 %v1782_v8, %v1710_v63 }
 0xc03   :  { %v2298_v15 = vor.u32 %v1785_v39, %v1728_v7 }
 0xc04   :  { %v792_v11 = vadd.f32 %v1695_v18, %v776_v25  ;;  %v1712_v18 = vld [vmem:[%s2640_s4 + $0x18] sm:$0xf0]  ;;  %907 = vmatpush.bf16.msra.mxu0 %v2327_v19  ;;  %1000 = vmatpush.bf16.msra.mxu2 %v2327_v19 }
 0xc05   :  { %918 = vmatpush.bf16.msra.mxu1 %v2298_v15  ;;  %1011 = vmatpush.bf16.msra.mxu3 %v2298_v15  ;;  %v2331_v25 = vor.u32 %v1781_v12, %v1712_v18 }
 0xc06   :  { %v1698_v28 = vmul.f32 -1.442695, %v792_v11  ;;  %v826_v11 = vpop.permute.xlu2 %825 }
 0xc08   :  { %1841 = vpow2.f32 %v1698_v28 }
 0xc09   :  { %v777_v29 = vpop.f32.mrf.mxu2  ;;  %v790_v32 = vpop.f32.mrf.mxu3  ;;  %919 = vmatpush.bf16.msra.mxu1 %v2311_v24  ;;  %1012 = vmatpush.bf16.msra.mxu3 %v2311_v24 }
 0xc0d   :  { %920 = vmatpush.bf16.msra.mxu1 %v2331_v25  ;;  %1013 = vmatpush.bf16.msra.mxu3 %v2331_v25 }
 0xc0e   :  { %v1842_v22 = vpop.eup %1841 }
 0xc0f   :  { %v796_v33 = vadd.f32 1.0, %v1842_v22 }
 0xc11   :  { %1843 = vrcp.f32 %v796_v33  ;;  %v808_v37 = vand.u32 2147483648, %v796_v33  ;;  %v806_v40 = vand.u32 2147483647, %v796_v33  ;;  %vm802_vm10 = vweird.f32 %v796_v33 }
 0xc13   :  { %v809_v43 = vor.u32 1.1754944e-38, %v808_v37  ;;  %vm807_vm12 = vcmp.eq.f32.partialorder %v806_v40, 8.507059e+37  ;;  %v1702_v37 = vld [vmem:[%s2640_s4] sm:$0xf]  ;;  %v1779_v40 = vld [vmem:[%s2640_s4 + $0x4] sm:$0xf] }
 0xc17   :  { %v1844_v35 = vpop.eup %1843 }
 0xc18   :  { %v798_v36 = vmul.f32 %v1844_v35, %v796_v33  ;;  %vm803_vm9 = vweird.f32 %v1844_v35 }
 0xc19   :  { %vm804_vm11 = vmor %vm802_vm10, %vm803_vm9 }
 0xc1a   :  { %v799_v34 = vsub.f32 1.0, %v798_v36 }
 0xc1c   :  { %v800_v38 = vmul.f32 %v1844_v35, %v799_v34  ;;  %v2344_v34 = vld [vmem:[%s2641_s7] sm:$0x3] }
 0xc1e   :  { %v801_v42 = vadd.f32 %v1844_v35, %v800_v38  ;;  %v1780_v38 = vld [vmem:[%s2640_s4 + $0x4] sm:$0xf0] }
 0xc20   :  { %v805_v47 = vsel %vm804_vm11, %v1844_v35, %v801_v42  ;;  %v2338_v35 = vld.sshfl [vmem:[#allocation1] sm:$0xff pattern:$0x73625140]  ;;  %v2356_v42 = vor.u32 %v1780_v38, %v1702_v37 }
 0xc21   :  { %v810_v48 = vsel %vm807_vm12, %v809_v43, %v805_v47  ;;  %v1704_v43 = vld [vmem:[%s2640_s4 + $0x8] sm:$0xf0] }
 0xc22   :  { %v812_v49 = vmul.f32 %v810_v48, %v789_v46  ;;  %v818_v23 = vsub.f32 1.0, %v810_v48  ;;  %v828_v29 = vmul.f32 %v826_v11, %v810_v48  ;;  %908 = vmatpush.bf16.msra.mxu0 %v2356_v42  ;;  %1001 = vmatpush.bf16.msra.mxu2 %v2356_v42  ;;  %v2386_v46 = vsel %vm70_vm4, 7, %v1900_v3  ;;  %v88_v3 = vld [vmem:[%s2642_s5] sm:$0x3] }
 0xc23   :  { %vm831_vm13 = vcmp.lt.s32.totalorder %v2386_v46, %v2083_v62  ;;  %v2414_v61 = vperm.slane %v88_v3, 0  ;;  %v851_v62 = vld [vmem:[%s2643_s1] sm:$0xf] }
 0xc24   :  { %v816_v50 = vadd.f32 %v814_v26, %v812_v49  ;;  %v2361_v26 = vor.u32 %v1779_v40, %v1704_v43  ;;  %v2391_v47 = vsel %vm831_vm13, 1.0, %v1903_v1 }
 0xc26   :  { %1845 = vtanh.f32 %v816_v50  ;;  %921 = vmatpush.bf16.msra.mxu1 %v2361_v26  ;;  %1014 = vmatpush.bf16.msra.mxu3 %v2361_v26 }
 0xc27   :  { %1088 = vmatpush.bf16.msrb.mxu0 %v2287_v54  ;;  %1178 = vmatpush.bf16.msrb.mxu2 %v2287_v54 }
 0xc2a   :  { %1101 = vmatpush.bf16.msrb.mxu1 %v2298_v15  ;;  %1191 = vmatpush.bf16.msrb.mxu3 %v2298_v15 }
 0xc2b   :  { %1089 = vmatpush.bf16.msrb.mxu0 %v2307_v57  ;;  %1179 = vmatpush.bf16.msrb.mxu2 %v2307_v57 }
 0xc2c   :  { %v1846_v53 = vpop.eup %1845 }
 0xc2d   :  { %820 = vrot.lane.b32.xlu1 %v1846_v53, %s1901_s3 }
 0xc2e   :  { %1102 = vmatpush.bf16.msrb.mxu1 %v2311_v24  ;;  %1192 = vmatpush.bf16.msrb.mxu3 %v2311_v24 }
 0xc2f   :  { %1090 = vmatpush.bf16.msrb.mxu0 %v2327_v19  ;;  %1180 = vmatpush.bf16.msrb.mxu2 %v2327_v19 }
 0xc32   :  { %1103 = vmatpush.bf16.msrb.mxu1 %v2331_v25  ;;  %1193 = vmatpush.bf16.msrb.mxu3 %v2331_v25 }
 0xc33   :  { %1091 = vmatpush.bf16.msrb.mxu0 %v2356_v42  ;;  %1181 = vmatpush.bf16.msrb.mxu2 %v2356_v42 }
 0xc36   :  { %1104 = vmatpush.bf16.msrb.mxu1 %v2361_v26  ;;  %1194 = vmatpush.bf16.msrb.mxu3 %v2361_v26 }
 0xc9f   :  { %v821_v28 = vpop.permute.xlu1 %820 }
 0xca0   :  { %v823_v32 = vmul.f32 %v821_v28, %v818_v23  ;;  %v2420_v23 = vperm.slane %v88_v3, 1 }
 0xca2   :  { %v829_v22 = vadd.f32 %v828_v29, %v823_v32 }
 0xca4   :  { %v834_v33 = vsub.f32 %v829_v22, %v826_v11 }
 0xca6   :  { %836 = vst [vmem:[#allocation1] ss:$4 sm:$0xff] %v834_v33 }
 0xcad   :  { %v837_v36 = vld.sshfl [vmem:[#allocation1] sm:$0xff pattern:$0x73625140] }
 0xcae   :  { %838 = vrot.lane.b32.xlu0 %v837_v36, %s1901_s3  ;;  %844 = vst [vmem:[#allocation1] ss:$4 sm:$0xff] %v829_v22  ;;  %v949_v22 = vrot.slane %v851_v62, 2 }
 0xcb6   :  { %966 = vperm.xlu0 %1797, %v2344_v34  }
 0xd20   :  { %v839_v48 = vpop.permute.xlu0 %838 }
 0xd21   :  { %v841_v49 = vmul.f32 %v2391_v47, %v839_v48 }
 0xd23   :  { %v2395_v50 = vadd.f32 %v841_v49, %v2264_v9 }
 0xd25   :  { %v852_v53 = vpack.c.bf16 %v2395_v50, %v2395_v50  ;;  %960 = vrot.lane.b32.xlu2 %v2395_v50, %s1901_s3 }
 0xd27   :  { %1732 = vmatmul.msk.bf16.vlgmr.msra.gmra.mxu0 %vm135_vm6, %v852_v53  ;;  %1733 = vmatmul.msk.bf16.vlgmr.msra.gmra.mxu1 %vm135_vm6, %v852_v53 }
 0xd28   :  { %1268 = vmatpush.bf16.msra.mxu0 %v2287_v54  ;;  %1281 = vmatpush.bf16.msra.mxu1 %v2298_v15 }
 0xd2c   :  { %1269 = vmatpush.bf16.msra.mxu0 %v2307_v57  ;;  %1282 = vmatpush.bf16.msra.mxu1 %v2311_v24 }
 0xd30   :  { %1270 = vmatpush.bf16.msra.mxu0 %v2327_v19  ;;  %1283 = vmatpush.bf16.msra.mxu1 %v2331_v25 }
 0xd34   :  { %1271 = vmatpush.bf16.msra.mxu0 %v2356_v42  ;;  %1284 = vmatpush.bf16.msra.mxu1 %v2361_v26 }
 0xd7f   :  { %v961_v49 = vpop.permute.xlu2 %960 }
 0xda4   :  { %v910_v9 = vpop.f32.mrf.mxu0  ;;  %v923_v4 = vpop.f32.mrf.mxu1 }
 0xda5   :  { %v911_v13 = vadd.f32 %v910_v9, %v2414_v61  ;;  %v924_v33 = vadd.f32 %v923_v4, %v2420_v23  ;;  %v2427_v4 = vpop.permute.xlu0 %966 }
 0xda6   :  { %vm968_vm1 = vcmp.lt.s32.totalorder %v2087_v0, %v2427_v4  ;;  %v1736_v0 = vld [vmem:[%s2643_s1 + $0x4] sm:$0xf]  ;;  %vm1058_vm8 = vcmp.lt.s32.totalorder %v2117_v51, %v2427_v4  ;;  %v1741_v51 = vld [vmem:[%s2643_s1 + $0x8] sm:$0xf]  ;;  %vm1148_vm13 = vcmp.lt.s32.totalorder %v2153_v44, %v2427_v4  ;;  %v1746_v44 = vld [vmem:[%s2643_s1 + $0xc] sm:$0xf] }
 0xda7   :  { %v927_v39 = vadd.f32 %v911_v13, %v851_v62 }
 0xda9   :  { %v1734_v7 = vmul.f32 -1.442695, %v927_v39 }
 0xdab   :  { %1847 = vpow2.f32 %v1734_v7  ;;  %v2424_v7 = vld.sshfl [vmem:[#allocation1] sm:$0xff pattern:$0x73625140] }
 0xdac   :  { %v912_v14 = vpop.f32.mrf.mxu0  ;;  %v925_v55 = vpop.f32.mrf.mxu1 }
 0xdad   :  { %v2432_v14 = vsel %vm968_vm1, 1.0, %v1903_v1  ;;  %vm1238_vm1 = vcmp.lt.s32.totalorder %v2189_v30, %v2427_v4 }
 0xdb1   :  { %v1848_v56 = vpop.eup %1847 }
 0xdb2   :  { %v931_v20 = vadd.f32 1.0, %v1848_v56 }
 0xdb4   :  { %1849 = vrcp.f32 %v931_v20  ;;  %v943_v18 = vand.u32 2147483648, %v931_v20  ;;  %v941_v28 = vand.u32 2147483647, %v931_v20  ;;  %vm937_vm14 = vweird.f32 %v931_v20 }
 0xdb6   :  { %v944_v32 = vor.u32 1.1754944e-38, %v943_v18  ;;  %vm942_vm0 = vcmp.eq.f32.partialorder %v941_v28, 8.507059e+37 }
 0xdba   :  { %v1850_v63 = vpop.eup %1849 }
 0xdbb   :  { %v933_v8 = vmul.f32 %v1850_v63, %v931_v20  ;;  %vm938_vm4 = vweird.f32 %v1850_v63 }
 0xdbc   :  { %vm939_vm15 = vmor %vm937_vm14, %vm938_vm4 }
 0xdbd   :  { %v934_v12 = vsub.f32 1.0, %v933_v8 }
 0xdbf   :  { %v935_v11 = vmul.f32 %v1850_v63, %v934_v12 }
 0xdc1   :  { %v936_v29 = vadd.f32 %v1850_v63, %v935_v11 }
 0xdc3   :  { %v940_v36 = vsel %vm939_vm15, %v1850_v63, %v936_v29 }
 0xdc4   :  { %v945_v37 = vsel %vm942_vm0, %v944_v32, %v940_v36 }
 0xdc5   :  { %v947_v38 = vmul.f32 %v945_v37, %v924_v33  ;;  %v953_v48 = vsub.f32 1.0, %v945_v37  ;;  %v963_v3 = vmul.f32 %v961_v49, %v945_v37 }
 0xdc7   :  { %v951_v40 = vadd.f32 %v949_v22, %v947_v38 }
 0xdc9   :  { %1851 = vtanh.f32 %v951_v40 }
 0xdcf   :  { %v1852_v43 = vpop.eup %1851 }
 0xdd0   :  { %955 = vrot.lane.b32.xlu1 %v1852_v43, %s1901_s3 }
 0xe42   :  { %v956_v53 = vpop.permute.xlu1 %955 }
 0xe43   :  { %v958_v9 = vmul.f32 %v956_v53, %v953_v48  ;;  %v1042_v53 = vrot.slane %v1736_v0, 2 }
 0xe45   :  { %v964_v13 = vadd.f32 %v963_v3, %v958_v9 }
 0xe47   :  { %v971_v39 = vsub.f32 %v964_v13, %v961_v49 }
 0xe49   :  { %973 = vst [vmem:[#allocation1] ss:$4 sm:$0xff] %v971_v39 }
 0xe50   :  { %v974_v62 = vld.sshfl [vmem:[#allocation1] sm:$0xff pattern:$0x73625140] }
 0xe51   :  { %975 = vrot.lane.b32.xlu1 %v974_v62, %s1901_s3  ;;  %981 = vst [vmem:[#allocation1] ss:$4 sm:$0xff] %v964_v13 }
 0xec3   :  { %v976_v55 = vpop.permute.xlu1 %975 }
 0xec4   :  { %v978_v56 = vmul.f32 %v2432_v14, %v976_v55 }
 0xec6   :  { %v979_v20 = vadd.f32 %v978_v56, %v2395_v50 }
 0xec8   :  { %v990_v63 = vpack.c.bf16 %v979_v20, %v979_v20  ;;  %1053 = vrot.lane.b32.xlu0 %v979_v20, %s1901_s3 }
 0xeca   :  { %1737 = vmatmul.msk.bf16.vlgmr.msra.gmra.mxu2 %vm135_vm6, %v990_v63  ;;  %1738 = vmatmul.msk.bf16.vlgmr.msra.gmra.mxu3 %vm135_vm6, %v990_v63 }
 0xecb   :  { %1358 = vmatpush.bf16.msra.mxu2 %v2287_v54  ;;  %1371 = vmatpush.bf16.msra.mxu3 %v2298_v15 }
 0xecf   :  { %1359 = vmatpush.bf16.msra.mxu2 %v2307_v57  ;;  %1372 = vmatpush.bf16.msra.mxu3 %v2311_v24 }
 0xed3   :  { %1360 = vmatpush.bf16.msra.mxu2 %v2327_v19  ;;  %1373 = vmatpush.bf16.msra.mxu3 %v2331_v25 }
 0xed7   :  { %1361 = vmatpush.bf16.msra.mxu2 %v2356_v42  ;;  %1374 = vmatpush.bf16.msra.mxu3 %v2361_v26 }
 0xf3a   :  { %v1054_v63 = vpop.permute.xlu0 %1053 }
 0xf4d   :  { %v1003_v50 = vpop.f32.mrf.mxu2  ;;  %v1016_v8 = vpop.f32.mrf.mxu3 }
 0xf4e   :  { %v1004_v12 = vadd.f32 %v1003_v50, %v2414_v61  ;;  %v1017_v3 = vadd.f32 %v1016_v8, %v2420_v23  ;;  %v2459_v8 = vsel %vm1058_vm8, 1.0, %v1903_v1  ;;  %vm1328_vm8 = vcmp.lt.s32.totalorder %v2212_v16, %v2427_v4 }
 0xf50   :  { %v1020_v18 = vadd.f32 %v1736_v0, %v1004_v12 }
 0xf52   :  { %v1739_v11 = vmul.f32 -1.442695, %v1020_v18 }
 0xf54   :  { %1853 = vpow2.f32 %v1739_v11 }
 0xf55   :  { %v1005_v28 = vpop.f32.mrf.mxu2  ;;  %v1018_v29 = vpop.f32.mrf.mxu3 }
 0xf56   :  { %v2453_v29 = vld.sshfl [vmem:[#allocation1] sm:$0xff pattern:$0x73625140] }
 0xf5a   :  { %v1854_v32 = vpop.eup %1853 }
 0xf5b   :  { %v1024_v22 = vadd.f32 1.0, %v1854_v32 }
 0xf5d   :  { %1855 = vrcp.f32 %v1024_v22  ;;  %v1036_v38 = vand.u32 2147483648, %v1024_v22  ;;  %v1034_v43 = vand.u32 2147483647, %v1024_v22  ;;  %vm1030_vm3 = vweird.f32 %v1024_v22 }
 0xf5f   :  { %v1037_v49 = vor.u32 1.1754944e-38, %v1036_v38  ;;  %vm1035_vm7 = vcmp.eq.f32.partialorder %v1034_v43, 8.507059e+37 }
 0xf63   :  { %v1856_v33 = vpop.eup %1855 }
 0xf64   :  { %v1026_v36 = vmul.f32 %v1856_v33, %v1024_v22  ;;  %vm1031_vm2 = vweird.f32 %v1856_v33 }
 0xf65   :  { %vm1032_vm5 = vmor %vm1030_vm3, %vm1031_vm2 }
 0xf66   :  { %v1027_v37 = vsub.f32 1.0, %v1026_v36 }
 0xf68   :  { %v1028_v40 = vmul.f32 %v1856_v33, %v1027_v37 }
 0xf6a   :  { %v1029_v48 = vadd.f32 %v1856_v33, %v1028_v40 }
 0xf6c   :  { %v1033_v9 = vsel %vm1032_vm5, %v1856_v33, %v1029_v48 }
 0xf6d   :  { %v1038_v13 = vsel %vm1035_vm7, %v1037_v49, %v1033_v9 }
 0xf6e   :  { %v1040_v39 = vmul.f32 %v1038_v13, %v1017_v3  ;;  %v1046_v56 = vsub.f32 1.0, %v1038_v13  ;;  %v1056_v12 = vmul.f32 %v1054_v63, %v1038_v13 }
 0xf70   :  { %v1044_v62 = vadd.f32 %v1042_v53, %v1040_v39 }
 0xf72   :  { %1857 = vtanh.f32 %v1044_v62 }
 0xf78   :  { %v1858_v55 = vpop.eup %1857 }
 0xf79   :  { %1048 = vrot.lane.b32.xlu2 %v1858_v55, %s1901_s3 }
 0xfd3   :  { %v1049_v50 = vpop.permute.xlu2 %1048 }
 0xfd4   :  { %v1051_v18 = vmul.f32 %v1049_v50, %v1046_v56 }
 0xfd6   :  { %v1057_v11 = vadd.f32 %v1056_v12, %v1051_v18  ;;  %v1132_v12 = vrot.slane %v1741_v51, 2 }
 0xfd8   :  { %v1061_v28 = vsub.f32 %v1057_v11, %v1054_v63 }
 0xfda   :  { %1063 = vst [vmem:[#allocation1] ss:$4 sm:$0xff] %v1061_v28 }
 0xfe1   :  { %v1064_v0 = vld.sshfl [vmem:[#allocation1] sm:$0xff pattern:$0x73625140] }
 0xfe2   :  { %1065 = vrot.lane.b32.xlu1 %v1064_v0, %s1901_s3  ;;  %1071 = vst [vmem:[#allocation1] ss:$4 sm:$0xff] %v1057_v11 }
0x1054   :  { %v1066_v32 = vpop.permute.xlu1 %1065 }
0x1055   :  { %v1068_v22 = vmul.f32 %v2459_v8, %v1066_v32 }
0x1057   :  { %v1069_v33 = vadd.f32 %v1068_v22, %v979_v20 }
0x1059   :  { %v1080_v36 = vpack.c.bf16 %v1069_v33, %v1069_v33  ;;  %1143 = vrot.lane.b32.xlu0 %v1069_v33, %s1901_s3 }
0x105b   :  { %1742 = vmatmul.msk.bf16.vlgmr.msrb.gmra.mxu0 %vm135_vm6, %v1080_v36  ;;  %1743 = vmatmul.msk.bf16.vlgmr.msrb.gmra.mxu1 %vm135_vm6, %v1080_v36 }
0x105c   :  { %1448 = vmatpush.bf16.msrb.mxu0 %v2287_v54  ;;  %1461 = vmatpush.bf16.msrb.mxu1 %v2298_v15 }
0x1060   :  { %1449 = vmatpush.bf16.msrb.mxu0 %v2307_v57  ;;  %1462 = vmatpush.bf16.msrb.mxu1 %v2311_v24 }
0x1064   :  { %1450 = vmatpush.bf16.msrb.mxu0 %v2327_v19  ;;  %1463 = vmatpush.bf16.msrb.mxu1 %v2331_v25 }
0x1068   :  { %1451 = vmatpush.bf16.msrb.mxu0 %v2356_v42  ;;  %1464 = vmatpush.bf16.msrb.mxu1 %v2361_v26 }
0x10d8   :  { %v1093_v20 = vpop.f32.mrf.mxu0  ;;  %v1106_v37 = vpop.f32.mrf.mxu1 }
0x10d9   :  { %v1094_v38 = vadd.f32 %v1093_v20, %v2414_v61  ;;  %v1107_v18 = vadd.f32 %v1106_v37, %v2420_v23  ;;  %v1144_v20 = vpop.permute.xlu0 %1143  ;;  %v2485_v37 = vsel %vm1148_vm13, 1.0, %v1903_v1  ;;  %vm1418_vm13 = vcmp.lt.s32.totalorder %v2234_v2, %v2427_v4  ;;  %v1761_v2 = vld [vmem:[%s2643_s1 + $0x18] sm:$0xf] }
0x10db   :  { %v1110_v40 = vadd.f32 %v1741_v51, %v1094_v38 }
0x10dd   :  { %v1744_v43 = vmul.f32 -1.442695, %v1110_v40 }
0x10df   :  { %1859 = vpow2.f32 %v1744_v43 }
0x10e0   :  { %v1095_v48 = vpop.f32.mrf.mxu0  ;;  %v1108_v49 = vpop.f32.mrf.mxu1 }
0x10e5   :  { %v1860_v53 = vpop.eup %1859 }
0x10e6   :  { %v1114_v3 = vadd.f32 1.0, %v1860_v53  ;;  %v2479_v53 = vld.sshfl [vmem:[#allocation1] sm:$0xff pattern:$0x73625140] }
0x10e8   :  { %1861 = vrcp.f32 %v1114_v3  ;;  %v1126_v62 = vand.u32 2147483648, %v1114_v3  ;;  %v1124_v56 = vand.u32 2147483647, %v1114_v3  ;;  %vm1120_vm10 = vweird.f32 %v1114_v3 }
0x10ea   :  { %v1127_v50 = vor.u32 1.1754944e-38, %v1126_v62  ;;  %vm1125_vm12 = vcmp.eq.f32.partialorder %v1124_v56, 8.507059e+37 }
0x10ee   :  { %v1862_v9 = vpop.eup %1861 }
0x10ef   :  { %v1116_v13 = vmul.f32 %v1862_v9, %v1114_v3  ;;  %vm1121_vm9 = vweird.f32 %v1862_v9 }
0x10f0   :  { %vm1122_vm11 = vmor %vm1120_vm10, %vm1121_vm9 }
0x10f1   :  { %v1117_v39 = vsub.f32 1.0, %v1116_v13 }
0x10f3   :  { %v1118_v55 = vmul.f32 %v1862_v9, %v1117_v39 }
0x10f5   :  { %v1119_v63 = vadd.f32 %v1862_v9, %v1118_v55 }
0x10f7   :  { %v1123_v11 = vsel %vm1122_vm11, %v1862_v9, %v1119_v63 }
0x10f8   :  { %v1128_v28 = vsel %vm1125_vm12, %v1127_v50, %v1123_v11 }
0x10f9   :  { %v1130_v0 = vmul.f32 %v1128_v28, %v1107_v18  ;;  %v1136_v36 = vsub.f32 1.0, %v1128_v28  ;;  %v1146_v40 = vmul.f32 %v1144_v20, %v1128_v28  ;;  %v1222_v28 = vrot.slane %v1746_v44, 2 }
0x10fb   :  { %v1134_v32 = vadd.f32 %v1132_v12, %v1130_v0 }
0x10fd   :  { %1863 = vtanh.f32 %v1134_v32 }
0x1103   :  { %v1864_v22 = vpop.eup %1863 }
0x1104   :  { %1138 = vrot.lane.b32.xlu2 %v1864_v22, %s1901_s3 }
0x115e   :  { %v1139_v38 = vpop.permute.xlu2 %1138 }
0x115f   :  { %v1141_v43 = vmul.f32 %v1139_v38, %v1136_v36 }
0x1161   :  { %v1147_v48 = vadd.f32 %v1146_v40, %v1141_v43 }
0x1163   :  { %v1151_v49 = vsub.f32 %v1147_v48, %v1144_v20 }
0x1165   :  { %1153 = vst [vmem:[#allocation1] ss:$4 sm:$0xff] %v1151_v49 }
0x116c   :  { %v1154_v51 = vld.sshfl [vmem:[#allocation1] sm:$0xff pattern:$0x73625140] }
0x116d   :  { %1155 = vrot.lane.b32.xlu1 %v1154_v51, %s1901_s3  ;;  %1161 = vst [vmem:[#allocation1] ss:$4 sm:$0xff] %v1147_v48 }
0x11df   :  { %v1156_v3 = vpop.permute.xlu1 %1155 }
0x11e0   :  { %v1158_v9 = vmul.f32 %v2485_v37, %v1156_v3 }
0x11e2   :  { %v1159_v13 = vadd.f32 %v1158_v9, %v1069_v33 }
0x11e4   :  { %v1170_v39 = vpack.c.bf16 %v1159_v13, %v1159_v13  ;;  %1233 = vrot.lane.b32.xlu0 %v1159_v13, %s1901_s3 }
0x11e6   :  { %1747 = vmatmul.msk.bf16.vlgmr.msrb.gmra.mxu2 %vm135_vm6, %v1170_v39  ;;  %1748 = vmatmul.msk.bf16.vlgmr.msrb.gmra.mxu3 %vm135_vm6, %v1170_v39  ;;  %v2505_v39 = vld.sshfl [vmem:[#allocation1] sm:$0xff pattern:$0x73625140] }
0x11e7   :  { %1538 = vmatpush.bf16.msrb.mxu2 %v2287_v54  ;;  %1551 = vmatpush.bf16.msrb.mxu3 %v2298_v15 }
0x11eb   :  { %1539 = vmatpush.bf16.msrb.mxu2 %v2307_v57  ;;  %1552 = vmatpush.bf16.msrb.mxu3 %v2311_v24 }
0x11ef   :  { %1540 = vmatpush.bf16.msrb.mxu2 %v2327_v19  ;;  %1553 = vmatpush.bf16.msrb.mxu3 %v2331_v25 }
0x11f3   :  { %1541 = vmatpush.bf16.msrb.mxu2 %v2356_v42  ;;  %1554 = vmatpush.bf16.msrb.mxu3 %v2361_v26 }
0x1256   :  { %v1234_v43 = vpop.permute.xlu0 %1233 }
0x1269   :  { %v1183_v33 = vpop.f32.mrf.mxu2  ;;  %v1196_v54 = vpop.f32.mrf.mxu3 }
0x126a   :  { %v1184_v15 = vadd.f32 %v1183_v33, %v2414_v61  ;;  %v1197_v0 = vadd.f32 %v1196_v54, %v2420_v23  ;;  %v2511_v33 = vsel %vm1238_vm1, 1.0, %v1903_v1  ;;  %vm50_vm1 = vcmp.gt.s32.totalorder %v2344_v34, 1 }
0x126c   :  { %v1200_v62 = vadd.f32 %v1746_v44, %v1184_v15 }
0x126e   :  { %v1749_v57 = vmul.f32 -1.442695, %v1200_v62 }
0x1270   :  { %1865 = vpow2.f32 %v1749_v57 }
0x1271   :  { %v1185_v24 = vpop.f32.mrf.mxu2  ;;  %v1198_v55 = vpop.f32.mrf.mxu3 }
0x1272   :  { %v1751_v24 = vld [vmem:[%s2643_s1 + $0x10] sm:$0xf] }
0x1276   :  { %v1866_v19 = vpop.eup %1865 }
0x1277   :  { %v1204_v56 = vadd.f32 1.0, %v1866_v19 }
0x1279   :  { %1867 = vrcp.f32 %v1204_v56  ;;  %v1216_v26 = vand.u32 2147483648, %v1204_v56  ;;  %v1214_v12 = vand.u32 2147483647, %v1204_v56  ;;  %vm1210_vm14 = vweird.f32 %v1204_v56 }
0x127b   :  { %v1217_v11 = vor.u32 1.1754944e-38, %v1216_v26  ;;  %vm1215_vm0 = vcmp.eq.f32.partialorder %v1214_v12, 8.507059e+37 }
0x127f   :  { %v1868_v25 = vpop.eup %1867 }
0x1280   :  { %v1206_v42 = vmul.f32 %v1868_v25, %v1204_v56  ;;  %vm1211_vm4 = vweird.f32 %v1868_v25 }
0x1281   :  { %vm1212_vm15 = vmor %vm1210_vm14, %vm1211_vm4 }
0x1282   :  { %v1207_v63 = vsub.f32 1.0, %v1206_v42 }
0x1284   :  { %v1208_v50 = vmul.f32 %v1868_v25, %v1207_v63 }
0x1286   :  { %v1209_v18 = vadd.f32 %v1868_v25, %v1208_v50 }
0x1288   :  { %v1213_v32 = vsel %vm1212_vm15, %v1868_v25, %v1209_v18 }
0x1289   :  { %v1218_v22 = vsel %vm1215_vm0, %v1217_v11, %v1213_v32 }
0x128a   :  { %v1220_v36 = vmul.f32 %v1218_v22, %v1197_v0  ;;  %v1226_v40 = vsub.f32 1.0, %v1218_v22  ;;  %v1236_v49 = vmul.f32 %v1234_v43, %v1218_v22 }
0x128c   :  { %v1224_v20 = vadd.f32 %v1222_v28, %v1220_v36  ;;  %v1312_v36 = vrot.slane %v1751_v24, 2 }
0x128e   :  { %1869 = vtanh.f32 %v1224_v20 }
0x1294   :  { %v1870_v38 = vpop.eup %1869 }
0x1295   :  { %1228 = vrot.lane.b32.xlu2 %v1870_v38, %s1901_s3 }
0x12ef   :  { %v1229_v48 = vpop.permute.xlu2 %1228 }
0x12f0   :  { %v1231_v51 = vmul.f32 %v1229_v48, %v1226_v40 }
0x12f2   :  { %v1237_v3 = vadd.f32 %v1236_v49, %v1231_v51 }
0x12f4   :  { %v1241_v9 = vsub.f32 %v1237_v3, %v1234_v43 }
0x12f6   :  { %1243 = vst [vmem:[#allocation1] ss:$4 sm:$0xff] %v1241_v9 }
0x12fd   :  { %v1244_v44 = vld.sshfl [vmem:[#allocation1] sm:$0xff pattern:$0x73625140] }
0x12fe   :  { %1245 = vrot.lane.b32.xlu1 %v1244_v44, %s1901_s3  ;;  %1251 = vst [vmem:[#allocation1] ss:$4 sm:$0xff] %v1237_v3 }
0x1370   :  { %v1246_v54 = vpop.permute.xlu1 %1245 }
0x1371   :  { %v1248_v15 = vmul.f32 %v2511_v33, %v1246_v54 }
0x1373   :  { %v1249_v62 = vadd.f32 %v1248_v15, %v1159_v13 }
0x1375   :  { %v1260_v57 = vpack.c.bf16 %v1249_v62, %v1249_v62  ;;  %1323 = vrot.lane.b32.xlu0 %v1249_v62, %s1901_s3 }
0x1377   :  { %1752 = vmatmul.msk.bf16.vlgmr.msra.gmra.mxu0 %vm135_vm6, %v1260_v57  ;;  %1753 = vmatmul.msk.bf16.vlgmr.msra.gmra.mxu1 %vm135_vm6, %v1260_v57 }
0x13e7   :  { %v1324_v3 = vpop.permute.xlu0 %1323 }
0x13f4   :  { %v1273_v55 = vpop.f32.mrf.mxu0  ;;  %v1286_v30 = vpop.f32.mrf.mxu1 }
0x13f5   :  { %v1274_v19 = vadd.f32 %v1273_v55, %v2414_v61  ;;  %v1287_v20 = vadd.f32 %v1286_v30, %v2420_v23  ;;  %v2523_v55 = vld.sshfl [vmem:[#allocation1] sm:$0xff pattern:$0x73625140]  ;;  %v2529_v30 = vsel %vm1328_vm8, 1.0, %v1903_v1 }
0x13f7   :  { %v1290_v56 = vadd.f32 %v1751_v24, %v1274_v19 }
0x13f9   :  { %v1754_v25 = vmul.f32 -1.442695, %v1290_v56 }
0x13fb   :  { %1871 = vpow2.f32 %v1754_v25 }
0x13fc   :  { %v1275_v42 = vpop.f32.mrf.mxu0  ;;  %v1288_v13 = vpop.f32.mrf.mxu1 }
0x13fd   :  { %v1756_v13 = vld [vmem:[%s2643_s1 + $0x14] sm:$0xf] }
0x1401   :  { %v1872_v63 = vpop.eup %1871 }
0x1402   :  { %v1294_v26 = vadd.f32 1.0, %v1872_v63 }
0x1404   :  { %1873 = vrcp.f32 %v1294_v26  ;;  %v1306_v11 = vand.u32 2147483648, %v1294_v26  ;;  %v1304_v0 = vand.u32 2147483647, %v1294_v26  ;;  %vm1300_vm3 = vweird.f32 %v1294_v26 }
0x1406   :  { %v1307_v22 = vor.u32 1.1754944e-38, %v1306_v11  ;;  %vm1305_vm7 = vcmp.eq.f32.partialorder %v1304_v0, 8.507059e+37 }
0x140a   :  { %v1874_v50 = vpop.eup %1873 }
0x140b   :  { %v1296_v12 = vmul.f32 %v1874_v50, %v1294_v26  ;;  %vm1301_vm2 = vweird.f32 %v1874_v50 }
0x140c   :  { %vm1302_vm5 = vmor %vm1300_vm3, %vm1301_vm2  ;;  %vm1508_vm2 = vcmp.lt.s32.totalorder %v2256_v58, %v2427_v4 }
0x140d   :  { %v1297_v18 = vsub.f32 1.0, %v1296_v12 }
0x140f   :  { %v1298_v28 = vmul.f32 %v1874_v50, %v1297_v18 }
0x1411   :  { %v1299_v32 = vadd.f32 %v1874_v50, %v1298_v28 }
0x1413   :  { %v1303_v38 = vsel %vm1302_vm5, %v1874_v50, %v1299_v32 }
0x1414   :  { %v1308_v40 = vsel %vm1305_vm7, %v1307_v22, %v1303_v38 }
0x1415   :  { %v1310_v43 = vmul.f32 %v1308_v40, %v1287_v20  ;;  %v1316_v51 = vsub.f32 1.0, %v1308_v40  ;;  %v1326_v44 = vmul.f32 %v1324_v3, %v1308_v40 }
0x1417   :  { %v1314_v48 = vadd.f32 %v1312_v36, %v1310_v43 }
0x1419   :  { %1875 = vtanh.f32 %v1314_v48  ;;  %v1402_v48 = vrot.slane %v1756_v13, 2 }
0x141f   :  { %v1876_v49 = vpop.eup %1875 }
0x1420   :  { %1318 = vrot.lane.b32.xlu2 %v1876_v49, %s1901_s3 }
0x147a   :  { %v1319_v9 = vpop.permute.xlu2 %1318 }
0x147b   :  { %v1321_v54 = vmul.f32 %v1319_v9, %v1316_v51 }
0x147d   :  { %v1327_v15 = vadd.f32 %v1326_v44, %v1321_v54 }
0x147f   :  { %v1331_v57 = vsub.f32 %v1327_v15, %v1324_v3 }
0x1481   :  { %1333 = vst [vmem:[#allocation1] ss:$4 sm:$0xff] %v1331_v57 }
0x1488   :  { %v1334_v24 = vld.sshfl [vmem:[#allocation1] sm:$0xff pattern:$0x73625140] }
0x1489   :  { %1335 = vrot.lane.b32.xlu1 %v1334_v24, %s1901_s3  ;;  %1341 = vst [vmem:[#allocation1] ss:$4 sm:$0xff] %v1327_v15 }
0x14fb   :  { %v1336_v19 = vpop.permute.xlu1 %1335 }
0x14fc   :  { %v1338_v56 = vmul.f32 %v2529_v30, %v1336_v19 }
0x14fe   :  { %v1339_v25 = vadd.f32 %v1338_v56, %v1249_v62 }
0x1500   :  { %v1350_v42 = vpack.c.bf16 %v1339_v25, %v1339_v25  ;;  %1413 = vrot.lane.b32.xlu0 %v1339_v25, %s1901_s3 }
0x1502   :  { %1757 = vmatmul.msk.bf16.vlgmr.msra.gmra.mxu2 %vm135_vm6, %v1350_v42  ;;  %1758 = vmatmul.msk.bf16.vlgmr.msra.gmra.mxu3 %vm135_vm6, %v1350_v42 }
0x1572   :  { %v1414_v57 = vpop.permute.xlu0 %1413 }
0x1585   :  { %v1363_v63 = vpop.f32.mrf.mxu2  ;;  %v1376_v16 = vpop.f32.mrf.mxu3 }
0x1586   :  { %v1364_v26 = vadd.f32 %v1363_v63, %v2414_v61  ;;  %v1377_v49 = vadd.f32 %v1376_v16, %v2420_v23  ;;  %v2547_v16 = vsel %vm1418_vm13, 1.0, %v1903_v1 }
0x1588   :  { %v1380_v50 = vadd.f32 %v1756_v13, %v1364_v26  ;;  %v2541_v26 = vld.sshfl [vmem:[#allocation1] sm:$0xff pattern:$0x73625140] }
0x158a   :  { %v1759_v12 = vmul.f32 -1.442695, %v1380_v50 }
0x158c   :  { %1877 = vpow2.f32 %v1759_v12 }
0x158d   :  { %v1365_v18 = vpop.f32.mrf.mxu2  ;;  %v1378_v62 = vpop.f32.mrf.mxu3 }
0x1592   :  { %v1878_v11 = vpop.eup %1877 }
0x1593   :  { %v1384_v28 = vadd.f32 1.0, %v1878_v11 }
0x1595   :  { %1879 = vrcp.f32 %v1384_v28  ;;  %v1396_v36 = vand.u32 2147483648, %v1384_v28  ;;  %v1394_v38 = vand.u32 2147483647, %v1384_v28  ;;  %vm1390_vm10 = vweird.f32 %v1384_v28 }
0x1597   :  { %v1397_v43 = vor.u32 1.1754944e-38, %v1396_v36  ;;  %vm1395_vm12 = vcmp.eq.f32.partialorder %v1394_v38, 8.507059e+37 }
0x159b   :  { %v1880_v0 = vpop.eup %1879 }
0x159c   :  { %v1386_v32 = vmul.f32 %v1880_v0, %v1384_v28  ;;  %vm1391_vm9 = vweird.f32 %v1880_v0 }
0x159d   :  { %vm1392_vm11 = vmor %vm1390_vm10, %vm1391_vm9 }
0x159e   :  { %v1387_v22 = vsub.f32 1.0, %v1386_v32 }
0x15a0   :  { %v1388_v20 = vmul.f32 %v1880_v0, %v1387_v22 }
0x15a2   :  { %v1389_v40 = vadd.f32 %v1880_v0, %v1388_v20 }
0x15a4   :  { %v1393_v51 = vsel %vm1392_vm11, %v1880_v0, %v1389_v40 }
0x15a5   :  { %v1398_v3 = vsel %vm1395_vm12, %v1397_v43, %v1393_v51 }
0x15a6   :  { %v1400_v9 = vmul.f32 %v1398_v3, %v1377_v49  ;;  %v1406_v15 = vsub.f32 1.0, %v1398_v3  ;;  %v1416_v19 = vmul.f32 %v1414_v57, %v1398_v3 }
0x15a8   :  { %v1404_v44 = vadd.f32 %v1402_v48, %v1400_v9 }
0x15aa   :  { %1881 = vtanh.f32 %v1404_v44 }
0x15b0   :  { %v1882_v54 = vpop.eup %1881 }
0x15b1   :  { %1408 = vrot.lane.b32.xlu2 %v1882_v54, %s1901_s3  ;;  %v1492_v54 = vrot.slane %v1761_v2, 2 }
0x160b   :  { %v1409_v24 = vpop.permute.xlu2 %1408 }
0x160c   :  { %v1411_v56 = vmul.f32 %v1409_v24, %v1406_v15 }
0x160e   :  { %v1417_v42 = vadd.f32 %v1416_v19, %v1411_v56 }
0x1610   :  { %v1421_v63 = vsub.f32 %v1417_v42, %v1414_v57 }
0x1612   :  { %1423 = vst [vmem:[#allocation1] ss:$4 sm:$0xff] %v1421_v63 }
0x1619   :  { %v1424_v13 = vld.sshfl [vmem:[#allocation1] sm:$0xff pattern:$0x73625140] }
0x161a   :  { %1425 = vrot.lane.b32.xlu1 %v1424_v13, %s1901_s3  ;;  %1431 = vst [vmem:[#allocation1] ss:$4 sm:$0xff] %v1417_v42 }
0x168c   :  { %v1426_v50 = vpop.permute.xlu1 %1425 }
0x168d   :  { %v1428_v12 = vmul.f32 %v2547_v16, %v1426_v50 }
0x168f   :  { %v2550_v18 = vadd.f32 %v1428_v12, %v1339_v25 }
0x1691   :  { %v1440_v62 = vpack.c.bf16 %v2550_v18, %v2550_v18  ;;  %1503 = vrot.lane.b32.xlu0 %v2550_v18, %s1901_s3 }
0x1693   :  { %1762 = vmatmul.msk.bf16.vlgmr.msrb.gmra.mxu0 %vm135_vm6, %v1440_v62  ;;  %1763 = vmatmul.msk.bf16.vlgmr.msrb.gmra.mxu1 %vm135_vm6, %v1440_v62 }
0x1703   :  { %v1504_v13 = vpop.permute.xlu0 %1503 }
0x1710   :  { %v1453_v11 = vpop.f32.mrf.mxu0  ;;  %v1466_v28 = vpop.f32.mrf.mxu1 }
0x1711   :  { %v1454_v0 = vadd.f32 %v1453_v11, %v2414_v61  ;;  %v1467_v15 = vadd.f32 %v1466_v28, %v2420_v23 }
0x1713   :  { %v1470_v25 = vadd.f32 %v1761_v2, %v1454_v0 }
0x1715   :  { %v1764_v32 = vmul.f32 -1.442695, %v1470_v25  ;;  %v1432_v25 = vld.sshfl [vmem:[#allocation1] sm:$0xff pattern:$0x73625140] }
0x1717   :  { %1883 = vpow2.f32 %v1764_v32  ;;  %v51_v32 = vsel %vm50_vm1, %v2344_v34, 1  ;;  %vm1598_vm1 = vcmp.lt.s32.totalorder %v2386_v46, %v2427_v4 }
0x1718   :  { %v1455_v22 = vpop.f32.mrf.mxu0  ;;  %v1468_v36 = vpop.f32.mrf.mxu1 }
0x171d   :  { %v1884_v20 = vpop.eup %1883 }
0x171e   :  { %v1474_v38 = vadd.f32 1.0, %v1884_v20 }
0x1720   :  { %1885 = vrcp.f32 %v1474_v38  ;;  %v1486_v49 = vand.u32 2147483648, %v1474_v38  ;;  %v1484_v3 = vand.u32 2147483647, %v1474_v38  ;;  %vm1480_vm14 = vweird.f32 %v1474_v38 }
0x1722   :  { %v1487_v44 = vor.u32 1.1754944e-38, %v1486_v49  ;;  %vm1485_vm0 = vcmp.eq.f32.partialorder %v1484_v3, 8.507059e+37 }
0x1726   :  { %v1886_v40 = vpop.eup %1885 }
0x1727   :  { %v1476_v43 = vmul.f32 %v1886_v40, %v1474_v38  ;;  %vm1481_vm4 = vweird.f32 %v1886_v40 }
0x1728   :  { %vm1482_vm15 = vmor %vm1480_vm14, %vm1481_vm4 }
0x1729   :  { %v1477_v48 = vsub.f32 1.0, %v1476_v43 }
0x172b   :  { %v1478_v51 = vmul.f32 %v1886_v40, %v1477_v48 }
0x172d   :  { %v1479_v9 = vadd.f32 %v1886_v40, %v1478_v51 }
0x172f   :  { %v1483_v57 = vsel %vm1482_vm15, %v1886_v40, %v1479_v9 }
0x1730   :  { %v1488_v24 = vsel %vm1485_vm0, %v1487_v44, %v1483_v57 }
0x1731   :  { %v1490_v19 = vmul.f32 %v1488_v24, %v1467_v15  ;;  %v1496_v63 = vsub.f32 1.0, %v1488_v24  ;;  %v1506_v12 = vmul.f32 %v1504_v13, %v1488_v24 }
0x1733   :  { %v1494_v56 = vadd.f32 %v1492_v54, %v1490_v19 }
0x1735   :  { %1887 = vtanh.f32 %v1494_v56 }
0x173b   :  { %v1888_v42 = vpop.eup %1887 }
0x173c   :  { %1498 = vrot.lane.b32.xlu2 %v1888_v42, %s1901_s3 }
0x1796   :  { %v1499_v50 = vpop.permute.xlu2 %1498 }
0x1797   :  { %v1501_v62 = vmul.f32 %v1499_v50, %v1496_v63 }
0x1799   :  { %v1507_v11 = vadd.f32 %v1506_v12, %v1501_v62 }
0x179b   :  { %v1511_v0 = vsub.f32 %v1507_v11, %v1504_v13 }
0x179d   :  { %1513 = vst [vmem:[#allocation1] ss:$4 sm:$0xff] %v1511_v0 }
0x17a4   :  { %v1514_v2 = vld.sshfl [vmem:[#allocation1] sm:$0xff pattern:$0x73625140] }
0x17a5   :  { %1515 = vrot.lane.b32.xlu1 %v1514_v2, %s1901_s3  ;;  %1521 = vst [vmem:[#allocation1] ss:$4 sm:$0xff] %v1507_v11 }
0x17ac   :  { %v1522_v28 = vld.sshfl [vmem:[#allocation1] sm:$0xff pattern:$0x73625140] }
0x17ad   :  { %983 = vrot.lane.b32.xlu1 %v2453_v29, %s1901_s3  ;;  %v52_v29 = vcvt.s32.f32 %v51_v32  ;;  %v1899_v32 = vld [vmem:[%s2639_s6] sm:$0x3] }
0x17ae   :  { %vm32_vm13 = vcmp.gt.s32.totalorder %v1899_v32, 1 }
0x17af   :  { %1889 = vrcp.f32 %v52_v29  ;;  %vm58_vm3 = vweird.f32 %v52_v29  ;;  %v64_v38 = vand.u32 2147483648, %v52_v29  ;;  %v62_v43 = vand.u32 2147483647, %v52_v29 }
0x17b1   :  { %vm63_vm8 = vcmp.eq.f32.partialorder %v62_v43, 8.507059e+37 }
0x17b5   :  { %1253 = vrot.lane.b32.xlu1 %v2523_v55, %s1901_s3  ;;  %v2581_v55 = vsel %vm1508_vm2, 1.0, %v1903_v1  ;;  %v1890_v36 = vpop.eup %1889 }
0x17b6   :  { %v54_v34 = vmul.f32 %v1890_v36, %v52_v29  ;;  %vm59_vm5 = vweird.f32 %v1890_v36 }
0x17b7   :  { %vm60_vm7 = vmor %vm58_vm3, %vm59_vm5 }
0x17bd   :  { %1523 = vrot.lane.b32.xlu1 %v1522_v28, %s1901_s3 }
0x17c5   :  { %300 = vrot.lane.b32.xlu1 %v2148_v41, %s1901_s3 }
0x17cd   :  { %573 = vrot.lane.b32.xlu1 %v2229_v59, %s1901_s3 }
0x17d5   :  { %846 = vrot.lane.b32.xlu1 %v2424_v7, %s1901_s3  ;;  %v55_v7 = vsub.f32 1.0, %v54_v34 }
0x17d7   :  { %v56_v58 = vmul.f32 %v1890_v36, %v55_v7 }
0x17d9   :  { %v57_v40 = vadd.f32 %v1890_v36, %v56_v58 }
0x17db   :  { %v61_v48 = vsel %vm60_vm7, %v1890_v36, %v57_v40 }
0x1817   :  { %v1516_v22 = vpop.permute.xlu1 %1515 }
0x1818   :  { %v1518_v41 = vmul.f32 %v2581_v55, %v1516_v22 }
0x181a   :  { %v1519_v59 = vadd.f32 %v1518_v41, %v2550_v18  ;;  %v65_v18 = vor.u32 1.1754944e-38, %v64_v38 }
0x181c   :  { %v1530_v20 = vpack.c.bf16 %v1519_v59, %v1519_v59  ;;  %1593 = vrot.lane.b32.xlu0 %v1519_v59, %s1901_s3  ;;  %v66_v49 = vsel %vm63_vm8, %v65_v18, %v61_v48 }
0x181e   :  { %1767 = vmatmul.msk.bf16.vlgmr.msrb.gmra.mxu2 %vm135_vm6, %v1530_v20  ;;  %1768 = vmatmul.msk.bf16.vlgmr.msrb.gmra.mxu3 %vm135_vm6, %v1530_v20 }
0x1824   :  { %1163 = vrot.lane.b32.xlu0 %v2505_v39, %s1901_s3  ;;  %v1766_v39 = vld [vmem:[%s2643_s1 + $0x1c] sm:$0xf] }
0x182c   :  { %1433 = vrot.lane.b32.xlu0 %v1432_v25, %s1901_s3 }
0x1834   :  { %1617 = vperm.xlu0 %1797, %v66_v49  }
0x183c   :  { %482 = vrot.lane.b32.xlu0 %v2207_v10, %s1901_s3 }
0x1844   :  { %755 = vrot.lane.b32.xlu0 %v2338_v35, %s1901_s3 }
0x188e   :  { %v1594_v22 = vpop.permute.xlu0 %1593 }
0x18a1   :  { %v1543_v51 = vpop.f32.mrf.mxu2  ;;  %v1556_v3 = vpop.f32.mrf.mxu3 }
0x18a2   :  { %v1544_v9 = vadd.f32 %v1543_v51, %v2414_v61  ;;  %v1582_v61 = vrot.slane %v1766_v39, 2  ;;  %v1557_v62 = vadd.f32 %v1556_v3, %v2420_v23  ;;  %v33_v23 = vsel %vm32_vm13, %v1899_v32, 1  ;;  %v984_v51 = vpop.permute.xlu1 %983 }
0x18a3   :  { %v34_v20 = vcvt.s32.f32 %v33_v23 }
0x18a4   :  { %v1560_v44 = vadd.f32 %v1766_v39, %v1544_v9 }
0x18a5   :  { %vm40_vm4 = vweird.f32 %v34_v20  ;;  %v46_v40 = vand.u32 2147483648, %v34_v20  ;;  %v44_v18 = vand.u32 2147483647, %v34_v20 }
0x18a6   :  { %v1769_v54 = vmul.f32 -1.442695, %v1560_v44  ;;  %v1164_v44 = vpop.permute.xlu0 %1163 }
0x18a7   :  { %v47_v48 = vor.u32 1.1754944e-38, %v46_v40  ;;  %vm45_vm0 = vcmp.eq.f32.partialorder %v44_v18, 8.507059e+37 }
0x18a8   :  { %1891 = vpow2.f32 %v1769_v54 }
0x18a9   :  { %v1545_v15 = vpop.f32.mrf.mxu2  ;;  %v1558_v57 = vpop.f32.mrf.mxu3 }
0x18aa   :  { %v1166_v15 = vmul.f32 %v2485_v37, %v1164_v44  ;;  %v1254_v57 = vpop.permute.xlu1 %1253  ;;  %v1770_v37 = vsel %vm1598_vm1, 1.0, %v1903_v1 }
0x18ae   :  { %v1892_v24 = vpop.eup %1891 }
0x18af   :  { %v1564_v19 = vadd.f32 1.0, %v1892_v24 }
0x18b1   :  { %1893 = vrcp.f32 %v1564_v19  ;;  %v1576_v35 = vand.u32 2147483648, %v1564_v19  ;;  %v1574_v13 = vand.u32 2147483647, %v1564_v19  ;;  %vm1570_vm10 = vweird.f32 %v1564_v19 }
0x18b3   :  { %v1577_v12 = vor.u32 1.1754944e-38, %v1576_v35  ;;  %vm1575_vm12 = vcmp.eq.f32.partialorder %v1574_v13, 8.507059e+37  ;;  %v1524_v13 = vpop.permute.xlu1 %1523 }
0x18b7   :  { %v1894_v10 = vpop.eup %1893 }
0x18b8   :  { %v1566_v56 = vmul.f32 %v1894_v10, %v1564_v19  ;;  %vm1571_vm9 = vweird.f32 %v1894_v10 }
0x18b9   :  { %vm1572_vm11 = vmor %vm1570_vm10, %vm1571_vm9 }
0x18ba   :  { %v1567_v42 = vsub.f32 1.0, %v1566_v56 }
0x18bc   :  { %v1568_v63 = vmul.f32 %v1894_v10, %v1567_v42  ;;  %v1434_v42 = vpop.permute.xlu0 %1433 }
0x18be   :  { %v1569_v50 = vadd.f32 %v1894_v10, %v1568_v63  ;;  %v1436_v63 = vmul.f32 %v2547_v16, %v1434_v42 }
0x18c0   :  { %v1573_v11 = vsel %vm1572_vm11, %v1894_v10, %v1569_v50 }
0x18c1   :  { %v1578_v0 = vsel %vm1575_vm12, %v1577_v12, %v1573_v11  ;;  %v301_v11 = vpop.permute.xlu1 %300 }
0x18c2   :  { %v1580_v25 = vmul.f32 %v1578_v0, %v1557_v62  ;;  %v1586_v29 = vsub.f32 1.0, %v1578_v0  ;;  %v1596_v59 = vmul.f32 %v1594_v22, %v1578_v0  ;;  %v303_v16 = vmul.f32 %v2122_v52, %v301_v11 }
0x18c4   :  { %v1584_v2 = vadd.f32 %v1582_v61, %v1580_v25  ;;  %v1618_v62 = vpop.permute.xlu0 %1617  ;;  %v304_v46 = vadd.f32 %v303_v16, %v2092_v6 }
0x18c6   :  { %1895 = vtanh.f32 %v1584_v2 }
0x18c7   :  { %1897 = vrcp.f32 %v34_v20 }
0x18c9   :  { %v574_v2 = vpop.permute.xlu1 %573 }
0x18ca   :  { %v576_v23 = vmul.f32 %v2217_v17, %v574_v2 }
0x18cc   :  { %v1896_v28 = vpop.eup %1895  ;;  %v483_v4 = vpop.permute.xlu0 %482 }
0x18cd   :  { %1588 = vrot.lane.b32.xlu2 %v1896_v28, %s1901_s3  ;;  %v1898_v7 = vpop.eup %1897  ;;  %v485_v1 = vmul.f32 %v2194_v31, %v483_v4 }
0x18ce   :  { %vm41_vm14 = vweird.f32 %v1898_v7 }
0x18cf   :  { %vm42_vm15 = vmor %vm40_vm4, %vm41_vm14 }
0x18d5   :  { %1073 = vrot.lane.b32.xlu2 %v2479_v53, %s1901_s3 }
0x18dd   :  { %1343 = vrot.lane.b32.xlu2 %v2541_v26, %s1901_s3  ;;  %v36_v26 = vmul.f32 %v1898_v7, %v34_v20 }
0x18df   :  { %v37_v58 = vsub.f32 1.0, %v36_v26 }
0x18e1   :  { %v38_v38 = vmul.f32 %v1898_v7, %v37_v58 }
0x18e3   :  { %v39_v43 = vadd.f32 %v1898_v7, %v38_v38 }
0x18e5   :  { %v43_v49 = vsel %vm42_vm15, %v1898_v7, %v39_v43 }
0x18e6   :  { %v48_v39 = vsel %vm45_vm0, %v47_v48, %v43_v49 }
0x1927   :  { %v1589_v41 = vpop.permute.xlu2 %1588 }
0x1928   :  { %v1591_v36 = vmul.f32 %v1589_v41, %v1586_v29  ;;  %v756_v41 = vpop.permute.xlu0 %755 }
0x1929   :  { %v758_v52 = vmul.f32 %v2261_v60, %v756_v41 }
0x192a   :  { %v1597_v34 = vadd.f32 %v1596_v59, %v1591_v36  ;;  %v847_v36 = vpop.permute.xlu1 %846 }
0x192b   :  { %v849_v6 = vmul.f32 %v2391_v47, %v847_v36 }
0x192c   :  { %1602 = vst [vmem:[#allocation1] ss:$4 sm:$0xff] %v1597_v34 }
0x192f   :  { %v1074_v3 = vpop.permute.xlu2 %1073 }
0x1930   :  { %v1076_v9 = vmul.f32 %v2459_v8, %v1074_v3 }
0x1933   :  { %v1603_v53 = vld.sshfl [vmem:[#allocation1] sm:$0xff pattern:$0x73625140] }
0x1934   :  { %1604 = vrot.lane.b32.xlu2 %v1603_v53, %s1901_s3 }
0x1937   :  { %v1344_v24 = vpop.permute.xlu2 %1343 }
0x1938   :  { %v1346_v10 = vmul.f32 %v2529_v30, %v1344_v24 }
0x193c   :  { %391 = vrot.lane.b32.xlu2 %v2184_v27, %s1901_s3  ;;  %v986_v27 = vmul.f32 %v2432_v14, %v984_v51  ;;  %v1526_v14 = vmul.f32 %v2581_v55, %v1524_v13 }
0x193e   :  { %v1077_v54 = vadd.f32 %v1076_v9, %v986_v27 }
0x1940   :  { %v1167_v19 = vadd.f32 %v1166_v15, %v1077_v54 }
0x1944   :  { %664 = vrot.lane.b32.xlu2 %v2251_v21, %s1901_s3  ;;  %v1256_v21 = vmul.f32 %v2511_v33, %v1254_v57 }
0x1946   :  { %v1257_v56 = vadd.f32 %v1256_v21, %v1167_v19 }
0x1948   :  { %v1347_v35 = vadd.f32 %v1346_v10, %v1257_v56 }
0x194a   :  { %v1437_v8 = vadd.f32 %v1436_v63, %v1347_v35 }
0x194c   :  { %1611 = vperm.xlu2 %1798, %v48_v39   ;;  %v1527_v12 = vadd.f32 %v1526_v14, %v1437_v8 }
0x198e   :  { %v1605_v50 = vpop.permute.xlu2 %1604 }
0x198f   :  { %v1607_v61 = vmul.f32 %v1770_v37, %v1605_v50 }
0x1991   :  { %v1608_v33 = vadd.f32 %v1607_v61, %v1527_v12 }
0x1993   :  { %v1620_v30 = vmul.f32 %v1618_v62, %v1608_v33 }
0x1995   :  { %1622 = vrot.lane.b32.xlu0 %v1620_v30, %s1901_s3 }
0x1996   :  { %v392_v0 = vpop.permute.xlu2 %391 }
0x1997   :  { %v394_v25 = vmul.f32 %v2158_v45, %v392_v0 }
0x1999   :  { %v395_v55 = vadd.f32 %v394_v25, %v304_v46 }
0x199b   :  { %v486_v32 = vadd.f32 %v485_v1, %v395_v55 }
0x199d   :  { %v577_v22 = vadd.f32 %v576_v23, %v486_v32 }
0x199e   :  { %v665_v28 = vpop.permute.xlu2 %664 }
0x199f   :  { %v667_v29 = vmul.f32 %v2239_v5, %v665_v28 }
0x19a1   :  { %v668_v59 = vadd.f32 %v667_v29, %v577_v22 }
0x19a3   :  { %v759_v45 = vadd.f32 %v758_v52, %v668_v59 }
0x19a5   :  { %v850_v20 = vadd.f32 %v849_v6, %v759_v45 }
0x19a6   :  { %v1612_v34 = vpop.permute.xlu2 %1611 }
0x19a7   :  { %v1614_v7 = vmul.f32 %v1612_v34, %v850_v20 }
0x1a07   :  { %v1623_v31 = vpop.permute.xlu0 %1622 }
0x1a08   :  { %v1625_v53 = vsel %vm135_vm6, %v1614_v7, %v1623_v31 }
0x1a09   :  { %1626 = vst [vmem:[%s2644_s8] sm:$0x3] %v1625_v53 }

</bundles_post_ra>
